<compile_context>
chip_gen: v7x
topology: tpu7x:2x2x1
jax: 0.10.0
libtpu: 0.0.40
codegen_flags: <defaults>
</compile_context>

<pallas_src>
import itertools
import math

import jax
import jax.numpy as jnp
import numpy as np
from jax.experimental import pallas as pl
from jax.experimental.pallas import tpu as pltpu

pad_convt = lambda ker_size, stride: int(math.ceil((ker_size - stride) / 2))
out_pad_convt = lambda ker_size, stride: 2 * pad_convt(ker_size, stride) - (ker_size - stride)

PREC = jax.lax.Precision.HIGHEST


# ----------------------------- fused Pallas kernel -----------------------------

def _make_fused_kernel(K, r, k1, p1, Hs, Ws):
    NPH = r * r                       # number of subpixel phases
    wp = Ws + 2                       # padded-canvas width of a phase map
    LP = (Hs + 2) * (Ws + 2)          # padded-flat length of a phase map
    G = wp + 1                        # guard margin (covers +/-1 row & col shifts)
    CIN3 = 4 * K                      # channels into the final 3x3 conv
    taps_k1 = list(itertools.product(range(k1), range(k1)))
    taps_3 = list(itertools.product(range(3), range(3)))

    def kernel(s_ref, ratz_ref, v_ref, d_ref, v1_ref, d1_ref, aty_ref,
               mixw_ref, w1_ref, b1_ref, wt_ref, bt_ref, w3_ref, b3_ref,
               mask_ref, out_ref,
               mix_g, s1s_g, cat_g, pat_b, pat_t, pat_f):
        bf16 = jnp.bfloat16
        f32 = jnp.float32

        # Zero-init the guarded canvases (guards must stay zero).
        mix_g[...] = jnp.zeros_like(mix_g)
        s1s_g[...] = jnp.zeros_like(s1s_g)
        cat_g[...] = jnp.zeros_like(cat_g)

        mask = mask_ref[...]                        # (1, LP) valid-position mask
        s_all = s_ref[0]                            # (NPH*K, LP)
        ratz = ratz_ref[0]
        v = v_ref[0]
        d = d_ref[0]
        v1 = v1_ref[0]
        d1 = d1_ref[0]
        mixw = mixw_ref[0]                          # (2K, K) = [AtA^T ; RAtRA^T]

        # ---- Stage A: channel mixes (exact f32 VPU FMAs) + residual terms ----
        for q in range(NPH):
            lo, hi = q * K, (q + 1) * K
            sq = s_all[lo:hi, :]                    # (K, LP)
            acc = mixw[:, 0:1] * sq[0:1, :]         # (2K, LP)
            for k in range(1, K):
                acc = acc + mixw[:, k:k + 1] * sq[k:k + 1, :]
            base = q * CIN3
            mix_g[lo:hi, G:G + LP] = acc[:K, :]                         # S1pre
            cat_g[base + K:base + 2 * K, G:G + LP] = acc[K:, :] - ratz[lo:hi, :]      # S2
            cat_g[base + 2 * K:base + 3 * K, G:G + LP] = sq - v[lo:hi, :] - d[lo:hi, :]   # T1
            cat_g[base + 3 * K:base + 4 * K, G:G + LP] = sq - v1[lo:hi, :] - d1[lo:hi, :]  # T2

        # ---- Stage B: S1_net strided conv as one bf16 MXU matmul ----
        for t, (ki, kj) in enumerate(taps_k1):
            pi, oi = (ki - p1) % r, (ki - p1) // r
            pj, oj = (kj - p1) % r, (kj - p1) // r
            src = (pi * r + pj) * K
            off = oi * wp + oj
            pat_b[t * K:(t + 1) * K, :] = mix_g[src:src + K, G + off:G + off + LP]
        s1c = jnp.dot(w1_ref[...], pat_b[...].astype(bf16),
                      preferred_element_type=f32)                       # (K, LP)
        s1c = s1c + b1_ref[...]
        s1c = jnp.where(s1c >= 0, s1c, 0.2 * s1c)
        s1c = (s1c - aty_ref[0]) * mask
        s1s_g[:, G:G + LP] = s1c

        # ---- Stage C: S1_t_net ConvTranspose via subpixel decomposition ----
        for t, (ki, kj) in enumerate(taps_k1):
            off = -((ki - p1) // r) * wp - ((kj - p1) // r)
            pat_t[t * K:(t + 1) * K, :] = s1s_g[:, G + off:G + off + LP]
        s1t = jnp.dot(wt_ref[...], pat_t[...].astype(bf16),
                      preferred_element_type=f32)                       # (NPH*K, LP)
        s1t = (s1t + bt_ref[...]) * mask
        for q in range(NPH):
            base = q * CIN3
            cat_g[base:base + K, G:G + LP] = s1t[q * K:(q + 1) * K, :]  # S1

        # ---- Stage D: S3_net 3x3 conv in phase space, one bf16 matmul ----
        for q in range(NPH):
            pe, pw = q // r, q % r
            for t, (ki, kj) in enumerate(taps_3):
                ai, pi = divmod(pe + ki - 1, r)
                aj, pj = divmod(pw + kj - 1, r)
                src = (pi * r + pj) * CIN3
                off = ai * wp + aj
                pat_f[t * CIN3:(t + 1) * CIN3, q * LP:(q + 1) * LP] = \
                    cat_g[src:src + CIN3, G + off:G + off + LP]
        s3 = jnp.dot(w3_ref[...], pat_f[...].astype(bf16),
                     preferred_element_type=f32)                        # (K, NPH*LP)
        b3 = b3_ref[...]
        for q in range(NPH):
            y = s3[:, q * LP:(q + 1) * LP] + b3
            y = jnp.where(y >= 0, y, 0.2 * y)
            out_ref[0, q * K:(q + 1) * K, :] = s_all[q * K:(q + 1) * K, :] - y

    return kernel


# ----------------------------- wrapper-side layout glue -----------------------------

def _space_to_depth_pf(x, r):
    # (N, K, H, W) -> (N, r*r*K, (H/r+2)*(W/r+2)); phase-major rows, zero-padded
    # "padded-flat" spatial layout per phase.
    N, K, H, W = x.shape
    Hs, Ws = H // r, W // r
    x = x.reshape(N, K, Hs, r, Ws, r).transpose(0, 3, 5, 1, 2, 4)
    x = x.reshape(N, r * r * K, Hs, Ws)
    x = jnp.pad(x, ((0, 0), (0, 0), (1, 1), (1, 1)))
    return x.reshape(N, r * r * K, (Hs + 2) * (Ws + 2))


def _depth_to_space_pf(y, N, K, H, W, r):
    Hs, Ws = H // r, W // r
    y = y.reshape(N, r, r, K, Hs + 2, Ws + 2)[:, :, :, :, 1:1 + Hs, 1:1 + Ws]
    y = y.transpose(0, 3, 4, 1, 5, 2)
    return y.reshape(N, K, H, W)


def _build_wt_big(wt, r, p1):
    # ConvTranspose weight (Cin, Cout, k1, k1) -> (r*r*Cout, k1*k1*Cin) block
    # matrix: row block q = output subpixel phase; taps that do not contribute
    # to a phase are zeroed.
    K = wt.shape[0]
    k1 = wt.shape[2]
    base = jnp.transpose(wt, (1, 2, 3, 0))          # (Cout, k1, k1, Cin)
    blocks = []
    for pe in range(r):
        for pw in range(r):
            m = np.zeros((k1, k1), np.float32)
            for ki in range(k1):
                for kj in range(k1):
                    if (ki - p1) % r == pe and (kj - p1) % r == pw:
                        m[ki, kj] = 1.0
            blocks.append((base * jnp.asarray(m)[None, :, :, None]).reshape(K, k1 * k1 * K))
    return jnp.concatenate(blocks, axis=0)


def spat_fusion_forward(params, S, AtA, AtY, RAtRA, RAtZ, V, D, V1, D1, out_iter,
                        feat_num, ratio):
    N, K, H, W = S.shape
    r = ratio
    assert H % r == 0 and W % r == 0
    k1 = r + r // 2
    p1 = pad_convt(k1, r)
    Hs, Ws = H // r, W // r
    NPH = r * r
    LP = (Hs + 2) * (Ws + 2)
    GUARD = Ws + 3
    GL = LP + 2 * GUARD
    CIN3 = 4 * K

    # ---- cheap layout plumbing (no im2col inflation) ----
    s_pf = _space_to_depth_pf(S, r)
    ratz_pf = _space_to_depth_pf(RAtZ, r)
    v_pf = _space_to_depth_pf(V, r)
    d_pf = _space_to_depth_pf(D, r)
    v1_pf = _space_to_depth_pf(V1, r)
    d1_pf = _space_to_depth_pf(D1, r)
    aty_pf = jnp.pad(AtY, ((0, 0), (0, 0), (1, 1), (1, 1))).reshape(N, K, LP)

    mixw = jnp.concatenate([AtA.transpose(0, 2, 1), RAtRA.transpose(0, 2, 1)], axis=1)

    w1_mat = jnp.transpose(params['s1_w'], (0, 2, 3, 1)).reshape(K, k1 * k1 * K)
    w1_mat = w1_mat.astype(jnp.bfloat16)
    b1 = params['s1_b'].reshape(K, 1)
    wt_big = _build_wt_big(params['s1t_w'], r, p1).astype(jnp.bfloat16)
    bt_big = jnp.tile(params['s1t_b'], NPH).reshape(NPH * K, 1)
    w3_mat = jnp.transpose(params['s3_w'][out_iter], (0, 2, 3, 1)).reshape(K, 9 * CIN3)
    w3_mat = w3_mat.astype(jnp.bfloat16)
    b3 = params['s3_b'][out_iter].reshape(K, 1)

    vm = np.zeros((Hs + 2, Ws + 2), np.float32)
    vm[1:1 + Hs, 1:1 + Ws] = 1.0
    mask = jnp.asarray(vm.reshape(1, LP))

    kernel = _make_fused_kernel(K, r, k1, p1, Hs, Ws)

    big = lambda n: (n, 0, 0)
    shared = lambda n: (0, 0)
    in_specs = [
        pl.BlockSpec((1, NPH * K, LP), big),      # S (phase, padded-flat)
        pl.BlockSpec((1, NPH * K, LP), big),      # RAtZ
        pl.BlockSpec((1, NPH * K, LP), big),      # V
        pl.BlockSpec((1, NPH * K, LP), big),      # D
        pl.BlockSpec((1, NPH * K, LP), big),      # V1
        pl.BlockSpec((1, NPH * K, LP), big),      # D1
        pl.BlockSpec((1, K, LP), big),            # AtY (padded-flat small grid)
        pl.BlockSpec((1, 2 * K, K), big),         # [AtA^T ; RAtRA^T]
        pl.BlockSpec((K, k1 * k1 * K), shared),   # S1_net weight
        pl.BlockSpec((K, 1), shared),             # S1_net bias
        pl.BlockSpec((NPH * K, k1 * k1 * K), shared),  # S1_t_net subpixel weight
        pl.BlockSpec((NPH * K, 1), shared),       # S1_t_net bias (per phase)
        pl.BlockSpec((K, 9 * CIN3), shared),      # S3_net[out_iter] weight
        pl.BlockSpec((K, 1), shared),             # S3_net bias
        pl.BlockSpec((1, LP), shared),            # valid-position mask
    ]

    out_pf = pl.pallas_call(
        kernel,
        grid=(N,),
        in_specs=in_specs,
        out_specs=pl.BlockSpec((1, NPH * K, LP), big),
        out_shape=jax.ShapeDtypeStruct((N, NPH * K, LP), jnp.float32),
        scratch_shapes=[
            pltpu.VMEM((NPH * K, GL), jnp.float32),        # guarded S1pre phases
            pltpu.VMEM((K, GL), jnp.float32),              # guarded S1 (small grid)
            pltpu.VMEM((NPH * CIN3, GL), jnp.float32),     # guarded [S1,S2,T1,T2] phases
            pltpu.VMEM((k1 * k1 * K, LP), jnp.float32),    # stage-B patches
            pltpu.VMEM((k1 * k1 * K, LP), jnp.float32),    # stage-C patches
            pltpu.VMEM((9 * CIN3, NPH * LP), jnp.float32), # stage-D patches
        ],
        compiler_params=pltpu.CompilerParams(
            dimension_semantics=("parallel",)),
    )(s_pf, ratz_pf, v_pf, d_pf, v1_pf, d1_pf, aty_pf, mixw,
      w1_mat, b1, wt_big, bt_big, w3_mat, b3, mask)

    return _depth_to_space_pf(out_pf, N, K, H, W, r)


# ----------------------------- pure-JAX reference -----------------------------

def reference_forward(params, S, AtA, AtY, RAtRA, RAtZ, V, D, V1, D1, out_iter,
                      feat_num, ratio):
    k1 = ratio + ratio // 2
    st = ratio
    p1 = pad_convt(k1, st)
    op1 = out_pad_convt(k1, st)
    dn = ('NCHW', 'OIHW', 'NCHW')

    S1 = jnp.einsum('nkl,nkhw->nlhw', AtA, S, precision=PREC)
    S1 = jax.lax.conv_general_dilated(S1, params['s1_w'], (st, st),
                                      [(p1, p1), (p1, p1)],
                                      dimension_numbers=dn, precision=PREC)
    S1 = S1 + params['s1_b'][None, :, None, None]
    S1 = jnp.where(S1 >= 0, S1, 0.2 * S1)
    S1 = S1 - AtY
    wt_conv = jnp.transpose(jnp.flip(params['s1t_w'], axis=(2, 3)), (1, 0, 2, 3))
    S1 = jax.lax.conv_general_dilated(S1, wt_conv, (1, 1),
                                      [(k1 - 1 - p1, k1 - 1 - p1 + op1)] * 2,
                                      lhs_dilation=(st, st),
                                      dimension_numbers=dn, precision=PREC)
    S1 = S1 + params['s1t_b'][None, :, None, None]
    S2 = jnp.einsum('nkl,nkhw->nlhw', RAtRA, S, precision=PREC) - RAtZ
    S3 = jnp.concatenate([S1, S2, S - V - D, S - V1 - D1], axis=1)
    S3 = jax.lax.conv_general_dilated(S3, params['s3_w'][out_iter], (1, 1),
                                      [(1, 1), (1, 1)],
                                      dimension_numbers=dn, precision=PREC)
    S3 = S3 + params['s3_b'][out_iter][None, :, None, None]
    S3 = jnp.where(S3 >= 0, S3, 0.2 * S3)
    return S - S3


# ----------------------------- params / main -----------------------------

def init_params(key, feat_num, ratio, out_stages):
    k1 = ratio + ratio // 2
    ks = jax.random.split(key, 6)

    def u(k, shape, fan_in):
        b = 1.0 / math.sqrt(fan_in)
        return jax.random.uniform(k, shape, jnp.float32, -b, b)

    return {
        's1_w':  u(ks[0], (feat_num, feat_num, k1, k1), feat_num * k1 * k1),
        's1_b':  u(ks[1], (feat_num,), feat_num * k1 * k1),
        's1t_w': u(ks[2], (feat_num, feat_num, k1, k1), feat_num * k1 * k1),
        's1t_b': u(ks[3], (feat_num,), feat_num * k1 * k1),
        's3_w':  u(ks[4], (out_stages, feat_num, feat_num * 4, 3, 3), feat_num * 4 * 9),
        's3_b':  u(ks[5], (out_stages, feat_num), feat_num * 4 * 9),
    }


if __name__ == "__main__":
    feat_num, ratio, out_stages = 4, 2, 2
    N, H, W = 2, 16, 16
    Hs, Ws = H // ratio, W // ratio
    out_iter = 1

    key = jax.random.PRNGKey(0)
    ks = jax.random.split(key, 10)
    S     = jax.random.normal(ks[0], (N, feat_num, H, W), jnp.float32)
    AtA   = jax.random.normal(ks[1], (N, feat_num, feat_num), jnp.float32)
    AtY   = jax.random.normal(ks[2], (N, feat_num, Hs, Ws), jnp.float32)
    RAtRA = jax.random.normal(ks[3], (N, feat_num, feat_num), jnp.float32)
    RAtZ  = jax.random.normal(ks[4], (N, feat_num, H, W), jnp.float32)
    V     = jax.random.normal(ks[5], (N, feat_num, H, W), jnp.float32)
    D     = jax.random.normal(ks[6], (N, feat_num, H, W), jnp.float32)
    V1    = jax.random.normal(ks[7], (N, feat_num, H, W), jnp.float32)
    D1    = jax.random.normal(ks[8], (N, feat_num, H, W), jnp.float32)
    params = init_params(ks[9], feat_num, ratio, out_stages)

    fwd = jax.jit(spat_fusion_forward, static_argnums=(10, 11, 12))
    out = fwd(params, S, AtA, AtY, RAtRA, RAtZ, V, D, V1, D1,
              out_iter, feat_num, ratio)
    out = jax.block_until_ready(out)

    ref = reference_forward(params, S, AtA, AtY, RAtRA, RAtZ, V, D, V1, D1,
                            out_iter, feat_num, ratio)
    ref = jax.block_until_ready(ref)

    np.testing.assert_allclose(np.asarray(out), np.asarray(ref), rtol=2e-2, atol=2e-2)
    print("KERNEL_OK")
</pallas_src>

<mosaic_0001>
module attributes {stable_mosaic.version = 11 : i64} {
  func.func @kernel(%arg0: i32, %arg1: memref<1x16x100xf32, #tpu.memory_space<vmem>>, %arg2: memref<1x16x100xf32, #tpu.memory_space<vmem>>, %arg3: memref<1x16x100xf32, #tpu.memory_space<vmem>>, %arg4: memref<1x16x100xf32, #tpu.memory_space<vmem>>, %arg5: memref<1x16x100xf32, #tpu.memory_space<vmem>>, %arg6: memref<1x16x100xf32, #tpu.memory_space<vmem>>, %arg7: memref<1x4x100xf32, #tpu.memory_space<vmem>>, %arg8: memref<1x8x4xf32, #tpu.memory_space<vmem>>, %arg9: memref<4x36xbf16, #tpu.memory_space<vmem>>, %arg10: memref<4x1xf32, #tpu.memory_space<vmem>>, %arg11: memref<16x36xbf16, #tpu.memory_space<vmem>>, %arg12: memref<16x1xf32, #tpu.memory_space<vmem>>, %arg13: memref<4x144xbf16, #tpu.memory_space<vmem>>, %arg14: memref<4x1xf32, #tpu.memory_space<vmem>>, %arg15: memref<1x100xf32, #tpu.memory_space<vmem>>, %arg16: memref<1x16x100xf32, #tpu.memory_space<vmem>>, %arg17: memref<16x122xf32, #tpu.memory_space<vmem>>, %arg18: memref<4x122xf32, #tpu.memory_space<vmem>>, %arg19: memref<64x122xf32, #tpu.memory_space<vmem>>, %arg20: memref<36x100xf32, #tpu.memory_space<vmem>>, %arg21: memref<36x100xf32, #tpu.memory_space<vmem>>, %arg22: memref<144x400xf32, #tpu.memory_space<vmem>>) attributes {dimension_semantics = [#tpu.dimension_semantics<parallel>], iteration_bounds = array<i64: 2>, scalar_prefetch = 0 : i64, scratch_operands = 6 : i64, tpu.core_type = #tpu.core_type<tc>, window_params = [{transform_indices = @transform_0, window_bounds = array<i64: 1, 16, 100>}, {transform_indices = @transform_1, window_bounds = array<i64: 1, 16, 100>}, {transform_indices = @transform_2, window_bounds = array<i64: 1, 16, 100>}, {transform_indices = @transform_3, window_bounds = array<i64: 1, 16, 100>}, {transform_indices = @transform_4, window_bounds = array<i64: 1, 16, 100>}, {transform_indices = @transform_5, window_bounds = array<i64: 1, 16, 100>}, {transform_indices = @transform_6, window_bounds = array<i64: 1, 4, 100>}, {transform_indices = @transform_7, window_bounds = array<i64: 1, 8, 4>}, {pipeline_mode = #tpu.pipeline_mode<synchronous>, transform_indices = @transform_8, window_bounds = array<i64: 4, 36>}, {pipeline_mode = #tpu.pipeline_mode<synchronous>, transform_indices = @transform_9, window_bounds = array<i64: 4, 1>}, {pipeline_mode = #tpu.pipeline_mode<synchronous>, transform_indices = @transform_10, window_bounds = array<i64: 16, 36>}, {pipeline_mode = #tpu.pipeline_mode<synchronous>, transform_indices = @transform_11, window_bounds = array<i64: 16, 1>}, {pipeline_mode = #tpu.pipeline_mode<synchronous>, transform_indices = @transform_12, window_bounds = array<i64: 4, 144>}, {pipeline_mode = #tpu.pipeline_mode<synchronous>, transform_indices = @transform_13, window_bounds = array<i64: 4, 1>}, {pipeline_mode = #tpu.pipeline_mode<synchronous>, transform_indices = @transform_14, window_bounds = array<i64: 1, 100>}, {transform_indices = @transform_15, window_bounds = array<i64: 1, 16, 100>}]} {
    %cst = arith.constant 0.000000e+00 : f32
    %0 = vector.broadcast %cst : f32 to vector<16x122xf32>
    %c0 = arith.constant 0 : index
    %c0_0 = arith.constant 0 : index
    %1 = vector.load %arg17[%c0, %c0_0] : memref<16x122xf32, #tpu.memory_space<vmem>>, vector<16x122xf32>
    tpu.vector_store %arg17[%c0, %c0_0], %0 {strides = array<i32>} : memref<16x122xf32, #tpu.memory_space<vmem>>, vector<16x122xf32>,
    %cst_1 = arith.constant 0.000000e+00 : f32
    %2 = vector.broadcast %cst_1 : f32 to vector<4x122xf32>
    %c0_2 = arith.constant 0 : index
    %c0_3 = arith.constant 0 : index
    %3 = vector.load %arg18[%c0_2, %c0_3] : memref<4x122xf32, #tpu.memory_space<vmem>>, vector<4x122xf32>
    tpu.vector_store %arg18[%c0_2, %c0_3], %2 {strides = array<i32>} : memref<4x122xf32, #tpu.memory_space<vmem>>, vector<4x122xf32>,
    %cst_4 = arith.constant 0.000000e+00 : f32
    %4 = vector.broadcast %cst_4 : f32 to vector<64x122xf32>
    %c0_5 = arith.constant 0 : index
    %c0_6 = arith.constant 0 : index
    %5 = vector.load %arg19[%c0_5, %c0_6] : memref<64x122xf32, #tpu.memory_space<vmem>>, vector<64x122xf32>
    tpu.vector_store %arg19[%c0_5, %c0_6], %4 {strides = array<i32>} : memref<64x122xf32, #tpu.memory_space<vmem>>, vector<64x122xf32>,
    %c0_7 = arith.constant 0 : index
    %c0_8 = arith.constant 0 : index
    %6 = vector.load %arg15[%c0_7, %c0_8] : memref<1x100xf32, #tpu.memory_space<vmem>>, vector<1x100xf32>
    %c0_9 = arith.constant 0 : index
    %c0_10 = arith.constant 0 : index
    %c0_11 = arith.constant 0 : index
    %7 = vector.load %arg1[%c0_9, %c0_10, %c0_11] : memref<1x16x100xf32, #tpu.memory_space<vmem>>, vector<1x16x100xf32>
    %8 = vector.shape_cast %7 : vector<1x16x100xf32> to vector<16x100xf32>
    %c0_12 = arith.constant 0 : index
    %c0_13 = arith.constant 0 : index
    %c0_14 = arith.constant 0 : index
    %9 = vector.load %arg2[%c0_12, %c0_13, %c0_14] : memref<1x16x100xf32, #tpu.memory_space<vmem>>, vector<1x16x100xf32>
    %10 = vector.shape_cast %9 : vector<1x16x100xf32> to vector<16x100xf32>
    %c0_15 = arith.constant 0 : index
    %c0_16 = arith.constant 0 : index
    %c0_17 = arith.constant 0 : index
    %11 = vector.load %arg3[%c0_15, %c0_16, %c0_17] : memref<1x16x100xf32, #tpu.memory_space<vmem>>, vector<1x16x100xf32>
    %12 = vector.shape_cast %11 : vector<1x16x100xf32> to vector<16x100xf32>
    %c0_18 = arith.constant 0 : index
    %c0_19 = arith.constant 0 : index
    %c0_20 = arith.constant 0 : index
    %13 = vector.load %arg4[%c0_18, %c0_19, %c0_20] : memref<1x16x100xf32, #tpu.memory_space<vmem>>, vector<1x16x100xf32>
    %14 = vector.shape_cast %13 : vector<1x16x100xf32> to vector<16x100xf32>
    %c0_21 = arith.constant 0 : index
    %c0_22 = arith.constant 0 : index
    %c0_23 = arith.constant 0 : index
    %15 = vector.load %arg5[%c0_21, %c0_22, %c0_23] : memref<1x16x100xf32, #tpu.memory_space<vmem>>, vector<1x16x100xf32>
    %16 = vector.shape_cast %15 : vector<1x16x100xf32> to vector<16x100xf32>
    %c0_24 = arith.constant 0 : index
    %c0_25 = arith.constant 0 : index
    %c0_26 = arith.constant 0 : index
    %17 = vector.load %arg6[%c0_24, %c0_25, %c0_26] : memref<1x16x100xf32, #tpu.memory_space<vmem>>, vector<1x16x100xf32>
    %18 = vector.shape_cast %17 : vector<1x16x100xf32> to vector<16x100xf32>
    %c0_27 = arith.constant 0 : index
    %c0_28 = arith.constant 0 : index
    %c0_29 = arith.constant 0 : index
    %19 = vector.load %arg8[%c0_27, %c0_28, %c0_29] : memref<1x8x4xf32, #tpu.memory_space<vmem>>, vector<1x8x4xf32>
    %20 = vector.shape_cast %19 : vector<1x8x4xf32> to vector<8x4xf32>
    %21 = vector.extract_strided_slice %8 {offsets = [0, 0], sizes = [4, 100], strides = [1, 1]} : vector<16x100xf32> to vector<4x100xf32>
    %22 = vector.extract_strided_slice %20 {offsets = [0, 0], sizes = [8, 1], strides = [1, 1]} : vector<8x4xf32> to vector<8x1xf32>
    %23 = vector.extract_strided_slice %21 {offsets = [0, 0], sizes = [1, 100], strides = [1, 1]} : vector<4x100xf32> to vector<1x100xf32>
    %24 = vector.broadcast %22 : vector<8x1xf32> to vector<8x100xf32>
    %25 = vector.broadcast %23 : vector<1x100xf32> to vector<8x100xf32>
    %26 = arith.mulf %24, %25 : vector<8x100xf32>
    %27 = vector.extract_strided_slice %20 {offsets = [0, 1], sizes = [8, 1], strides = [1, 1]} : vector<8x4xf32> to vector<8x1xf32>
    %28 = vector.extract_strided_slice %21 {offsets = [1, 0], sizes = [1, 100], strides = [1, 1]} : vector<4x100xf32> to vector<1x100xf32>
    %29 = vector.broadcast %27 : vector<8x1xf32> to vector<8x100xf32>
    %30 = vector.broadcast %28 : vector<1x100xf32> to vector<8x100xf32>
    %31 = arith.mulf %29, %30 : vector<8x100xf32>
    %32 = arith.addf %26, %31 : vector<8x100xf32>
    %33 = vector.extract_strided_slice %20 {offsets = [0, 2], sizes = [8, 1], strides = [1, 1]} : vector<8x4xf32> to vector<8x1xf32>
    %34 = vector.extract_strided_slice %21 {offsets = [2, 0], sizes = [1, 100], strides = [1, 1]} : vector<4x100xf32> to vector<1x100xf32>
    %35 = vector.broadcast %33 : vector<8x1xf32> to vector<8x100xf32>
    %36 = vector.broadcast %34 : vector<1x100xf32> to vector<8x100xf32>
    %37 = arith.mulf %35, %36 : vector<8x100xf32>
    %38 = arith.addf %32, %37 : vector<8x100xf32>
    %39 = vector.extract_strided_slice %20 {offsets = [0, 3], sizes = [8, 1], strides = [1, 1]} : vector<8x4xf32> to vector<8x1xf32>
    %40 = vector.extract_strided_slice %21 {offsets = [3, 0], sizes = [1, 100], strides = [1, 1]} : vector<4x100xf32> to vector<1x100xf32>
    %41 = vector.broadcast %39 : vector<8x1xf32> to vector<8x100xf32>
    %42 = vector.broadcast %40 : vector<1x100xf32> to vector<8x100xf32>
    %43 = arith.mulf %41, %42 : vector<8x100xf32>
    %44 = arith.addf %38, %43 : vector<8x100xf32>
    %45 = vector.extract_strided_slice %44 {offsets = [0, 0], sizes = [4, 100], strides = [1, 1]} : vector<8x100xf32> to vector<4x100xf32>
    %c0_30 = arith.constant 0 : index
    %c11 = arith.constant 11 : index
    %46 = vector.load %arg17[%c0_30, %c11] : memref<16x122xf32, #tpu.memory_space<vmem>>, vector<4x100xf32>
    tpu.vector_store %arg17[%c0_30, %c11], %45 {strides = array<i32>} : memref<16x122xf32, #tpu.memory_space<vmem>>, vector<4x100xf32>,
    %47 = vector.extract_strided_slice %44 {offsets = [4, 0], sizes = [4, 100], strides = [1, 1]} : vector<8x100xf32> to vector<4x100xf32>
    %48 = vector.extract_strided_slice %10 {offsets = [0, 0], sizes = [4, 100], strides = [1, 1]} : vector<16x100xf32> to vector<4x100xf32>
    %49 = arith.subf %47, %48 : vector<4x100xf32>
    %c4 = arith.constant 4 : index
    %c11_31 = arith.constant 11 : index
    %50 = vector.load %arg19[%c4, %c11_31] : memref<64x122xf32, #tpu.memory_space<vmem>>, vector<4x100xf32>
    tpu.vector_store %arg19[%c4, %c11_31], %49 {strides = array<i32>} : memref<64x122xf32, #tpu.memory_space<vmem>>, vector<4x100xf32>,
    %51 = vector.extract_strided_slice %12 {offsets = [0, 0], sizes = [4, 100], strides = [1, 1]} : vector<16x100xf32> to vector<4x100xf32>
    %52 = arith.subf %21, %51 : vector<4x100xf32>
    %53 = vector.extract_strided_slice %14 {offsets = [0, 0], sizes = [4, 100], strides = [1, 1]} : vector<16x100xf32> to vector<4x100xf32>
    %54 = arith.subf %52, %53 : vector<4x100xf32>
    %c8 = arith.constant 8 : index
    %c11_32 = arith.constant 11 : index
    %55 = vector.load %arg19[%c8, %c11_32] : memref<64x122xf32, #tpu.memory_space<vmem>>, vector<4x100xf32>
    tpu.vector_store %arg19[%c8, %c11_32], %54 {strides = array<i32>} : memref<64x122xf32, #tpu.memory_space<vmem>>, vector<4x100xf32>,
    %56 = vector.extract_strided_slice %16 {offsets = [0, 0], sizes = [4, 100], strides = [1, 1]} : vector<16x100xf32> to vector<4x100xf32>
    %57 = arith.subf %21, %56 : vector<4x100xf32>
    %58 = vector.extract_strided_slice %18 {offsets = [0, 0], sizes = [4, 100], strides = [1, 1]} : vector<16x100xf32> to vector<4x100xf32>
    %59 = arith.subf %57, %58 : vector<4x100xf32>
    %c12 = arith.constant 12 : index
    %c11_33 = arith.constant 11 : index
    %60 = vector.load %arg19[%c12, %c11_33] : memref<64x122xf32, #tpu.memory_space<vmem>>, vector<4x100xf32>
    tpu.vector_store %arg19[%c12, %c11_33], %59 {strides = array<i32>} : memref<64x122xf32, #tpu.memory_space<vmem>>, vector<4x100xf32>,
    %61 = vector.extract_strided_slice %8 {offsets = [4, 0], sizes = [4, 100], strides = [1, 1]} : vector<16x100xf32> to vector<4x100xf32>
    %62 = vector.extract_strided_slice %20 {offsets = [0, 0], sizes = [8, 1], strides = [1, 1]} : vector<8x4xf32> to vector<8x1xf32>
    %63 = vector.extract_strided_slice %61 {offsets = [0, 0], sizes = [1, 100], strides = [1, 1]} : vector<4x100xf32> to vector<1x100xf32>
    %64 = vector.broadcast %62 : vector<8x1xf32> to vector<8x100xf32>
    %65 = vector.broadcast %63 : vector<1x100xf32> to vector<8x100xf32>
    %66 = arith.mulf %64, %65 : vector<8x100xf32>
    %67 = vector.extract_strided_slice %20 {offsets = [0, 1], sizes = [8, 1], strides = [1, 1]} : vector<8x4xf32> to vector<8x1xf32>
    %68 = vector.extract_strided_slice %61 {offsets = [1, 0], sizes = [1, 100], strides = [1, 1]} : vector<4x100xf32> to vector<1x100xf32>
    %69 = vector.broadcast %67 : vector<8x1xf32> to vector<8x100xf32>
    %70 = vector.broadcast %68 : vector<1x100xf32> to vector<8x100xf32>
    %71 = arith.mulf %69, %70 : vector<8x100xf32>
    %72 = arith.addf %66, %71 : vector<8x100xf32>
    %73 = vector.extract_strided_slice %20 {offsets = [0, 2], sizes = [8, 1], strides = [1, 1]} : vector<8x4xf32> to vector<8x1xf32>
    %74 = vector.extract_strided_slice %61 {offsets = [2, 0], sizes = [1, 100], strides = [1, 1]} : vector<4x100xf32> to vector<1x100xf32>
    %75 = vector.broadcast %73 : vector<8x1xf32> to vector<8x100xf32>
    %76 = vector.broadcast %74 : vector<1x100xf32> to vector<8x100xf32>
    %77 = arith.mulf %75, %76 : vector<8x100xf32>
    %78 = arith.addf %72, %77 : vector<8x100xf32>
    %79 = vector.extract_strided_slice %20 {offsets = [0, 3], sizes = [8, 1], strides = [1, 1]} : vector<8x4xf32> to vector<8x1xf32>
    %80 = vector.extract_strided_slice %61 {offsets = [3, 0], sizes = [1, 100], strides = [1, 1]} : vector<4x100xf32> to vector<1x100xf32>
    %81 = vector.broadcast %79 : vector<8x1xf32> to vector<8x100xf32>
    %82 = vector.broadcast %80 : vector<1x100xf32> to vector<8x100xf32>
    %83 = arith.mulf %81, %82 : vector<8x100xf32>
    %84 = arith.addf %78, %83 : vector<8x100xf32>
    %85 = vector.extract_strided_slice %84 {offsets = [0, 0], sizes = [4, 100], strides = [1, 1]} : vector<8x100xf32> to vector<4x100xf32>
    %c4_34 = arith.constant 4 : index
    %c11_35 = arith.constant 11 : index
    %86 = vector.load %arg17[%c4_34, %c11_35] : memref<16x122xf32, #tpu.memory_space<vmem>>, vector<4x100xf32>
    tpu.vector_store %arg17[%c4_34, %c11_35], %85 {strides = array<i32>} : memref<16x122xf32, #tpu.memory_space<vmem>>, vector<4x100xf32>,
    %87 = vector.extract_strided_slice %84 {offsets = [4, 0], sizes = [4, 100], strides = [1, 1]} : vector<8x100xf32> to vector<4x100xf32>
    %88 = vector.extract_strided_slice %10 {offsets = [4, 0], sizes = [4, 100], strides = [1, 1]} : vector<16x100xf32> to vector<4x100xf32>
    %89 = arith.subf %87, %88 : vector<4x100xf32>
    %c20 = arith.constant 20 : index
    %c11_36 = arith.constant 11 : index
    %90 = vector.load %arg19[%c20, %c11_36] : memref<64x122xf32, #tpu.memory_space<vmem>>, vector<4x100xf32>
    tpu.vector_store %arg19[%c20, %c11_36], %89 {strides = array<i32>} : memref<64x122xf32, #tpu.memory_space<vmem>>, vector<4x100xf32>,
    %91 = vector.extract_strided_slice %12 {offsets = [4, 0], sizes = [4, 100], strides = [1, 1]} : vector<16x100xf32> to vector<4x100xf32>
    %92 = arith.subf %61, %91 : vector<4x100xf32>
    %93 = vector.extract_strided_slice %14 {offsets = [4, 0], sizes = [4, 100], strides = [1, 1]} : vector<16x100xf32> to vector<4x100xf32>
    %94 = arith.subf %92, %93 : vector<4x100xf32>
    %c24 = arith.constant 24 : index
    %c11_37 = arith.constant 11 : index
    %95 = vector.load %arg19[%c24, %c11_37] : memref<64x122xf32, #tpu.memory_space<vmem>>, vector<4x100xf32>
    tpu.vector_store %arg19[%c24, %c11_37], %94 {strides = array<i32>} : memref<64x122xf32, #tpu.memory_space<vmem>>, vector<4x100xf32>,
    %96 = vector.extract_strided_slice %16 {offsets = [4, 0], sizes = [4, 100], strides = [1, 1]} : vector<16x100xf32> to vector<4x100xf32>
    %97 = arith.subf %61, %96 : vector<4x100xf32>
    %98 = vector.extract_strided_slice %18 {offsets = [4, 0], sizes = [4, 100], strides = [1, 1]} : vector<16x100xf32> to vector<4x100xf32>
    %99 = arith.subf %97, %98 : vector<4x100xf32>
    %c28 = arith.constant 28 : index
    %c11_38 = arith.constant 11 : index
    %100 = vector.load %arg19[%c28, %c11_38] : memref<64x122xf32, #tpu.memory_space<vmem>>, vector<4x100xf32>
    tpu.vector_store %arg19[%c28, %c11_38], %99 {strides = array<i32>} : memref<64x122xf32, #tpu.memory_space<vmem>>, vector<4x100xf32>,
    %101 = vector.extract_strided_slice %8 {offsets = [8, 0], sizes = [4, 100], strides = [1, 1]} : vector<16x100xf32> to vector<4x100xf32>
    %102 = vector.extract_strided_slice %20 {offsets = [0, 0], sizes = [8, 1], strides = [1, 1]} : vector<8x4xf32> to vector<8x1xf32>
    %103 = vector.extract_strided_slice %101 {offsets = [0, 0], sizes = [1, 100], strides = [1, 1]} : vector<4x100xf32> to vector<1x100xf32>
    %104 = vector.broadcast %102 : vector<8x1xf32> to vector<8x100xf32>
    %105 = vector.broadcast %103 : vector<1x100xf32> to vector<8x100xf32>
    %106 = arith.mulf %104, %105 : vector<8x100xf32>
    %107 = vector.extract_strided_slice %20 {offsets = [0, 1], sizes = [8, 1], strides = [1, 1]} : vector<8x4xf32> to vector<8x1xf32>
    %108 = vector.extract_strided_slice %101 {offsets = [1, 0], sizes = [1, 100], strides = [1, 1]} : vector<4x100xf32> to vector<1x100xf32>
    %109 = vector.broadcast %107 : vector<8x1xf32> to vector<8x100xf32>
    %110 = vector.broadcast %108 : vector<1x100xf32> to vector<8x100xf32>
    %111 = arith.mulf %109, %110 : vector<8x100xf32>
    %112 = arith.addf %106, %111 : vector<8x100xf32>
    %113 = vector.extract_strided_slice %20 {offsets = [0, 2], sizes = [8, 1], strides = [1, 1]} : vector<8x4xf32> to vector<8x1xf32>
    %114 = vector.extract_strided_slice %101 {offsets = [2, 0], sizes = [1, 100], strides = [1, 1]} : vector<4x100xf32> to vector<1x100xf32>
    %115 = vector.broadcast %113 : vector<8x1xf32> to vector<8x100xf32>
    %116 = vector.broadcast %114 : vector<1x100xf32> to vector<8x100xf32>
    %117 = arith.mulf %115, %116 : vector<8x100xf32>
    %118 = arith.addf %112, %117 : vector<8x100xf32>
    %119 = vector.extract_strided_slice %20 {offsets = [0, 3], sizes = [8, 1], strides = [1, 1]} : vector<8x4xf32> to vector<8x1xf32>
    %120 = vector.extract_strided_slice %101 {offsets = [3, 0], sizes = [1, 100], strides = [1, 1]} : vector<4x100xf32> to vector<1x100xf32>
    %121 = vector.broadcast %119 : vector<8x1xf32> to vector<8x100xf32>
    %122 = vector.broadcast %120 : vector<1x100xf32> to vector<8x100xf32>
    %123 = arith.mulf %121, %122 : vector<8x100xf32>
    %124 = arith.addf %118, %123 : vector<8x100xf32>
    %125 = vector.extract_strided_slice %124 {offsets = [0, 0], sizes = [4, 100], strides = [1, 1]} : vector<8x100xf32> to vector<4x100xf32>
    %c8_39 = arith.constant 8 : index
    %c11_40 = arith.constant 11 : index
    %126 = vector.load %arg17[%c8_39, %c11_40] : memref<16x122xf32, #tpu.memory_space<vmem>>, vector<4x100xf32>
    tpu.vector_store %arg17[%c8_39, %c11_40], %125 {strides = array<i32>} : memref<16x122xf32, #tpu.memory_space<vmem>>, vector<4x100xf32>,
    %127 = vector.extract_strided_slice %124 {offsets = [4, 0], sizes = [4, 100], strides = [1, 1]} : vector<8x100xf32> to vector<4x100xf32>
    %128 = vector.extract_strided_slice %10 {offsets = [8, 0], sizes = [4, 100], strides = [1, 1]} : vector<16x100xf32> to vector<4x100xf32>
    %129 = arith.subf %127, %128 : vector<4x100xf32>
    %c36 = arith.constant 36 : index
    %c11_41 = arith.constant 11 : index
    %130 = vector.load %arg19[%c36, %c11_41] : memref<64x122xf32, #tpu.memory_space<vmem>>, vector<4x100xf32>
    tpu.vector_store %arg19[%c36, %c11_41], %129 {strides = array<i32>} : memref<64x122xf32, #tpu.memory_space<vmem>>, vector<4x100xf32>,
    %131 = vector.extract_strided_slice %12 {offsets = [8, 0], sizes = [4, 100], strides = [1, 1]} : vector<16x100xf32> to vector<4x100xf32>
    %132 = arith.subf %101, %131 : vector<4x100xf32>
    %133 = vector.extract_strided_slice %14 {offsets = [8, 0], sizes = [4, 100], strides = [1, 1]} : vector<16x100xf32> to vector<4x100xf32>
    %134 = arith.subf %132, %133 : vector<4x100xf32>
    %c40 = arith.constant 40 : index
    %c11_42 = arith.constant 11 : index
    %135 = vector.load %arg19[%c40, %c11_42] : memref<64x122xf32, #tpu.memory_space<vmem>>, vector<4x100xf32>
    tpu.vector_store %arg19[%c40, %c11_42], %134 {strides = array<i32>} : memref<64x122xf32, #tpu.memory_space<vmem>>, vector<4x100xf32>,
    %136 = vector.extract_strided_slice %16 {offsets = [8, 0], sizes = [4, 100], strides = [1, 1]} : vector<16x100xf32> to vector<4x100xf32>
    %137 = arith.subf %101, %136 : vector<4x100xf32>
    %138 = vector.extract_strided_slice %18 {offsets = [8, 0], sizes = [4, 100], strides = [1, 1]} : vector<16x100xf32> to vector<4x100xf32>
    %139 = arith.subf %137, %138 : vector<4x100xf32>
    %c44 = arith.constant 44 : index
    %c11_43 = arith.constant 11 : index
    %140 = vector.load %arg19[%c44, %c11_43] : memref<64x122xf32, #tpu.memory_space<vmem>>, vector<4x100xf32>
    tpu.vector_store %arg19[%c44, %c11_43], %139 {strides = array<i32>} : memref<64x122xf32, #tpu.memory_space<vmem>>, vector<4x100xf32>,
    %141 = vector.extract_strided_slice %8 {offsets = [12, 0], sizes = [4, 100], strides = [1, 1]} : vector<16x100xf32> to vector<4x100xf32>
    %142 = vector.extract_strided_slice %20 {offsets = [0, 0], sizes = [8, 1], strides = [1, 1]} : vector<8x4xf32> to vector<8x1xf32>
    %143 = vector.extract_strided_slice %141 {offsets = [0, 0], sizes = [1, 100], strides = [1, 1]} : vector<4x100xf32> to vector<1x100xf32>
    %144 = vector.broadcast %142 : vector<8x1xf32> to vector<8x100xf32>
    %145 = vector.broadcast %143 : vector<1x100xf32> to vector<8x100xf32>
    %146 = arith.mulf %144, %145 : vector<8x100xf32>
    %147 = vector.extract_strided_slice %20 {offsets = [0, 1], sizes = [8, 1], strides = [1, 1]} : vector<8x4xf32> to vector<8x1xf32>
    %148 = vector.extract_strided_slice %141 {offsets = [1, 0], sizes = [1, 100], strides = [1, 1]} : vector<4x100xf32> to vector<1x100xf32>
    %149 = vector.broadcast %147 : vector<8x1xf32> to vector<8x100xf32>
    %150 = vector.broadcast %148 : vector<1x100xf32> to vector<8x100xf32>
    %151 = arith.mulf %149, %150 : vector<8x100xf32>
    %152 = arith.addf %146, %151 : vector<8x100xf32>
    %153 = vector.extract_strided_slice %20 {offsets = [0, 2], sizes = [8, 1], strides = [1, 1]} : vector<8x4xf32> to vector<8x1xf32>
    %154 = vector.extract_strided_slice %141 {offsets = [2, 0], sizes = [1, 100], strides = [1, 1]} : vector<4x100xf32> to vector<1x100xf32>
    %155 = vector.broadcast %153 : vector<8x1xf32> to vector<8x100xf32>
    %156 = vector.broadcast %154 : vector<1x100xf32> to vector<8x100xf32>
    %157 = arith.mulf %155, %156 : vector<8x100xf32>
    %158 = arith.addf %152, %157 : vector<8x100xf32>
    %159 = vector.extract_strided_slice %20 {offsets = [0, 3], sizes = [8, 1], strides = [1, 1]} : vector<8x4xf32> to vector<8x1xf32>
    %160 = vector.extract_strided_slice %141 {offsets = [3, 0], sizes = [1, 100], strides = [1, 1]} : vector<4x100xf32> to vector<1x100xf32>
    %161 = vector.broadcast %159 : vector<8x1xf32> to vector<8x100xf32>
    %162 = vector.broadcast %160 : vector<1x100xf32> to vector<8x100xf32>
    %163 = arith.mulf %161, %162 : vector<8x100xf32>
    %164 = arith.addf %158, %163 : vector<8x100xf32>
    %165 = vector.extract_strided_slice %164 {offsets = [0, 0], sizes = [4, 100], strides = [1, 1]} : vector<8x100xf32> to vector<4x100xf32>
    %c12_44 = arith.constant 12 : index
    %c11_45 = arith.constant 11 : index
    %166 = vector.load %arg17[%c12_44, %c11_45] : memref<16x122xf32, #tpu.memory_space<vmem>>, vector<4x100xf32>
    tpu.vector_store %arg17[%c12_44, %c11_45], %165 {strides = array<i32>} : memref<16x122xf32, #tpu.memory_space<vmem>>, vector<4x100xf32>,
    %167 = vector.extract_strided_slice %164 {offsets = [4, 0], sizes = [4, 100], strides = [1, 1]} : vector<8x100xf32> to vector<4x100xf32>
    %168 = vector.extract_strided_slice %10 {offsets = [12, 0], sizes = [4, 100], strides = [1, 1]} : vector<16x100xf32> to vector<4x100xf32>
    %169 = arith.subf %167, %168 : vector<4x100xf32>
    %c52 = arith.constant 52 : index
    %c11_46 = arith.constant 11 : index
    %170 = vector.load %arg19[%c52, %c11_46] : memref<64x122xf32, #tpu.memory_space<vmem>>, vector<4x100xf32>
    tpu.vector_store %arg19[%c52, %c11_46], %169 {strides = array<i32>} : memref<64x122xf32, #tpu.memory_space<vmem>>, vector<4x100xf32>,
    %171 = vector.extract_strided_slice %12 {offsets = [12, 0], sizes = [4, 100], strides = [1, 1]} : vector<16x100xf32> to vector<4x100xf32>
    %172 = arith.subf %141, %171 : vector<4x100xf32>
    %173 = vector.extract_strided_slice %14 {offsets = [12, 0], sizes = [4, 100], strides = [1, 1]} : vector<16x100xf32> to vector<4x100xf32>
    %174 = arith.subf %172, %173 : vector<4x100xf32>
    %c56 = arith.constant 56 : index
    %c11_47 = arith.constant 11 : index
    %175 = vector.load %arg19[%c56, %c11_47] : memref<64x122xf32, #tpu.memory_space<vmem>>, vector<4x100xf32>
    tpu.vector_store %arg19[%c56, %c11_47], %174 {strides = array<i32>} : memref<64x122xf32, #tpu.memory_space<vmem>>, vector<4x100xf32>,
    %176 = vector.extract_strided_slice %16 {offsets = [12, 0], sizes = [4, 100], strides = [1, 1]} : vector<16x100xf32> to vector<4x100xf32>
    %177 = arith.subf %141, %176 : vector<4x100xf32>
    %178 = vector.extract_strided_slice %18 {offsets = [12, 0], sizes = [4, 100], strides = [1, 1]} : vector<16x100xf32> to vector<4x100xf32>
    %179 = arith.subf %177, %178 : vector<4x100xf32>
    %c60 = arith.constant 60 : index
    %c11_48 = arith.constant 11 : index
    %180 = vector.load %arg19[%c60, %c11_48] : memref<64x122xf32, #tpu.memory_space<vmem>>, vector<4x100xf32>
    tpu.vector_store %arg19[%c60, %c11_48], %179 {strides = array<i32>} : memref<64x122xf32, #tpu.memory_space<vmem>>, vector<4x100xf32>,
    %c12_49 = arith.constant 12 : index
    %c0_50 = arith.constant 0 : index
    %181 = vector.load %arg17[%c12_49, %c0_50] : memref<16x122xf32, #tpu.memory_space<vmem>>, vector<4x100xf32>
    %c0_51 = arith.constant 0 : index
    %c0_52 = arith.constant 0 : index
    %182 = vector.load %arg20[%c0_51, %c0_52] : memref<36x100xf32, #tpu.memory_space<vmem>>, vector<4x100xf32>
    tpu.vector_store %arg20[%c0_51, %c0_52], %181 {strides = array<i32>} : memref<36x100xf32, #tpu.memory_space<vmem>>, vector<4x100xf32>,
    %c8_53 = arith.constant 8 : index
    %c1 = arith.constant 1 : index
    %183 = vector.load %arg17[%c8_53, %c1] : memref<16x122xf32, #tpu.memory_space<vmem>>, vector<4x100xf32>
    %c4_54 = arith.constant 4 : index
    %c0_55 = arith.constant 0 : index
    %184 = vector.load %arg20[%c4_54, %c0_55] : memref<36x100xf32, #tpu.memory_space<vmem>>, vector<4x100xf32>
    tpu.vector_store %arg20[%c4_54, %c0_55], %183 {strides = array<i32>} : memref<36x100xf32, #tpu.memory_space<vmem>>, vector<4x100xf32>,
    %c12_56 = arith.constant 12 : index
    %c1_57 = arith.constant 1 : index
    %185 = vector.load %arg17[%c12_56, %c1_57] : memref<16x122xf32, #tpu.memory_space<vmem>>, vector<4x100xf32>
    %c8_58 = arith.constant 8 : index
    %c0_59 = arith.constant 0 : index
    %186 = vector.load %arg20[%c8_58, %c0_59] : memref<36x100xf32, #tpu.memory_space<vmem>>, vector<4x100xf32>
    tpu.vector_store %arg20[%c8_58, %c0_59], %185 {strides = array<i32>} : memref<36x100xf32, #tpu.memory_space<vmem>>, vector<4x100xf32>,
    %c4_60 = arith.constant 4 : index
    %c10 = arith.constant 10 : index
    %187 = vector.load %arg17[%c4_60, %c10] : memref<16x122xf32, #tpu.memory_space<vmem>>, vector<4x100xf32>
    %c12_61 = arith.constant 12 : index
    %c0_62 = arith.constant 0 : index
    %188 = vector.load %arg20[%c12_61, %c0_62] : memref<36x100xf32, #tpu.memory_space<vmem>>, vector<4x100xf32>
    tpu.vector_store %arg20[%c12_61, %c0_62], %187 {strides = array<i32>} : memref<36x100xf32, #tpu.memory_space<vmem>>, vector<4x100xf32>,
    %c0_63 = arith.constant 0 : index
    %c11_64 = arith.constant 11 : index
    %189 = vector.load %arg17[%c0_63, %c11_64] : memref<16x122xf32, #tpu.memory_space<vmem>>, vector<4x100xf32>
    %c16 = arith.constant 16 : index
    %c0_65 = arith.constant 0 : index
    %190 = vector.load %arg20[%c16, %c0_65] : memref<36x100xf32, #tpu.memory_space<vmem>>, vector<4x100xf32>
    tpu.vector_store %arg20[%c16, %c0_65], %189 {strides = array<i32>} : memref<36x100xf32, #tpu.memory_space<vmem>>, vector<4x100xf32>,
    %c4_66 = arith.constant 4 : index
    %c11_67 = arith.constant 11 : index
    %191 = vector.load %arg17[%c4_66, %c11_67] : memref<16x122xf32, #tpu.memory_space<vmem>>, vector<4x100xf32>
    %c20_68 = arith.constant 20 : index
    %c0_69 = arith.constant 0 : index
    %192 = vector.load %arg20[%c20_68, %c0_69] : memref<36x100xf32, #tpu.memory_space<vmem>>, vector<4x100xf32>
    tpu.vector_store %arg20[%c20_68, %c0_69], %191 {strides = array<i32>} : memref<36x100xf32, #tpu.memory_space<vmem>>, vector<4x100xf32>,
    %c12_70 = arith.constant 12 : index
    %c10_71 = arith.constant 10 : index
    %193 = vector.load %arg17[%c12_70, %c10_71] : memref<16x122xf32, #tpu.memory_space<vmem>>, vector<4x100xf32>
    %c24_72 = arith.constant 24 : index
    %c0_73 = arith.constant 0 : index
    %194 = vector.load %arg20[%c24_72, %c0_73] : memref<36x100xf32, #tpu.memory_space<vmem>>, vector<4x100xf32>
    tpu.vector_store %arg20[%c24_72, %c0_73], %193 {strides = array<i32>} : memref<36x100xf32, #tpu.memory_space<vmem>>, vector<4x100xf32>,
    %c8_74 = arith.constant 8 : index
    %c11_75 = arith.constant 11 : index
    %195 = vector.load %arg17[%c8_74, %c11_75] : memref<16x122xf32, #tpu.memory_space<vmem>>, vector<4x100xf32>
    %c28_76 = arith.constant 28 : index
    %c0_77 = arith.constant 0 : index
    %196 = vector.load %arg20[%c28_76, %c0_77] : memref<36x100xf32, #tpu.memory_space<vmem>>, vector<4x100xf32>
    tpu.vector_store %arg20[%c28_76, %c0_77], %195 {strides = array<i32>} : memref<36x100xf32, #tpu.memory_space<vmem>>, vector<4x100xf32>,
    %c12_78 = arith.constant 12 : index
    %c11_79 = arith.constant 11 : index
    %197 = vector.load %arg17[%c12_78, %c11_79] : memref<16x122xf32, #tpu.memory_space<vmem>>, vector<4x100xf32>
    %c32 = arith.constant 32 : index
    %c0_80 = arith.constant 0 : index
    %198 = vector.load %arg20[%c32, %c0_80] : memref<36x100xf32, #tpu.memory_space<vmem>>, vector<4x100xf32>
    tpu.vector_store %arg20[%c32, %c0_80], %197 {strides = array<i32>} : memref<36x100xf32, #tpu.memory_space<vmem>>, vector<4x100xf32>,
    %c0_81 = arith.constant 0 : index
    %c0_82 = arith.constant 0 : index
    %199 = vector.load %arg9[%c0_81, %c0_82] : memref<4x36xbf16, #tpu.memory_space<vmem>>, vector<4x36xbf16>
    %c0_83 = arith.constant 0 : index
    %c0_84 = arith.constant 0 : index
    %200 = vector.load %arg20[%c0_83, %c0_84] : memref<36x100xf32, #tpu.memory_space<vmem>>, vector<36x100xf32>
    %201 = arith.truncf %200 : vector<36x100xf32> to vector<36x100xbf16>
    %cst_85 = arith.constant dense<0.000000e+00> : vector<4x100xf32>
    %202 = tpu.matmul %199, %201, %cst_85 {dimension_numbers = #tpu.dot_dimension_numbers<[1], [0], [0], [1], [0, 0, 1, 1], [], []>} : vector<4x36xbf16>, vector<36x100xbf16>, vector<4x100xf32> -> vector<4x100xf32>
    %c0_86 = arith.constant 0 : index
    %c0_87 = arith.constant 0 : index
    %203 = vector.load %arg10[%c0_86, %c0_87] : memref<4x1xf32, #tpu.memory_space<vmem>>, vector<4x1xf32>
    %204 = vector.broadcast %203 : vector<4x1xf32> to vector<4x100xf32>
    %205 = arith.addf %202, %204 : vector<4x100xf32>
    %cst_88 = arith.constant 0.000000e+00 : f32
    %206 = vector.broadcast %cst_88 : f32 to vector<4x100xf32>
    %207 = arith.cmpf oge, %205, %206 : vector<4x100xf32>
    %cst_89 = arith.constant 2.000000e-01 : f32
    %208 = vector.broadcast %cst_89 : f32 to vector<4x100xf32>
    %209 = arith.mulf %208, %205 : vector<4x100xf32>
    %210 = arith.select %207, %205, %209 : vector<4x100xi1>, vector<4x100xf32>
    %c0_90 = arith.constant 0 : index
    %c0_91 = arith.constant 0 : index
    %c0_92 = arith.constant 0 : index
    %211 = vector.load %arg7[%c0_90, %c0_91, %c0_92] : memref<1x4x100xf32, #tpu.memory_space<vmem>>, vector<1x4x100xf32>
    %212 = vector.shape_cast %211 : vector<1x4x100xf32> to vector<4x100xf32>
    %213 = arith.subf %210, %212 : vector<4x100xf32>
    %214 = vector.broadcast %6 : vector<1x100xf32> to vector<4x100xf32>
    %215 = arith.mulf %213, %214 : vector<4x100xf32>
    %c0_93 = arith.constant 0 : index
    %c11_94 = arith.constant 11 : index
    %216 = vector.load %arg18[%c0_93, %c11_94] : memref<4x122xf32, #tpu.memory_space<vmem>>, vector<4x100xf32>
    tpu.vector_store %arg18[%c0_93, %c11_94], %215 {strides = array<i32>} : memref<4x122xf32, #tpu.memory_space<vmem>>, vector<4x100xf32>,
    %c0_95 = arith.constant 0 : index
    %c22 = arith.constant 22 : index
    %217 = vector.load %arg18[%c0_95, %c22] : memref<4x122xf32, #tpu.memory_space<vmem>>, vector<4x100xf32>
    %c0_96 = arith.constant 0 : index
    %c0_97 = arith.constant 0 : index
    %218 = vector.load %arg21[%c0_96, %c0_97] : memref<36x100xf32, #tpu.memory_space<vmem>>, vector<4x100xf32>
    tpu.vector_store %arg21[%c0_96, %c0_97], %217 {strides = array<i32>} : memref<36x100xf32, #tpu.memory_space<vmem>>, vector<4x100xf32>,
    %c0_98 = arith.constant 0 : index
    %c21 = arith.constant 21 : index
    %219 = vector.load %arg18[%c0_98, %c21] : memref<4x122xf32, #tpu.memory_space<vmem>>, vector<4x100xf32>
    %c4_99 = arith.constant 4 : index
    %c0_100 = arith.constant 0 : index
    %220 = vector.load %arg21[%c4_99, %c0_100] : memref<36x100xf32, #tpu.memory_space<vmem>>, vector<4x100xf32>
    tpu.vector_store %arg21[%c4_99, %c0_100], %219 {strides = array<i32>} : memref<36x100xf32, #tpu.memory_space<vmem>>, vector<4x100xf32>,
    %c0_101 = arith.constant 0 : index
    %c21_102 = arith.constant 21 : index
    %221 = vector.load %arg18[%c0_101, %c21_102] : memref<4x122xf32, #tpu.memory_space<vmem>>, vector<4x100xf32>
    %c8_103 = arith.constant 8 : index
    %c0_104 = arith.constant 0 : index
    %222 = vector.load %arg21[%c8_103, %c0_104] : memref<36x100xf32, #tpu.memory_space<vmem>>, vector<4x100xf32>
    tpu.vector_store %arg21[%c8_103, %c0_104], %221 {strides = array<i32>} : memref<36x100xf32, #tpu.memory_space<vmem>>, vector<4x100xf32>,
    %c0_105 = arith.constant 0 : index
    %c12_106 = arith.constant 12 : index
    %223 = vector.load %arg18[%c0_105, %c12_106] : memref<4x122xf32, #tpu.memory_space<vmem>>, vector<4x100xf32>
    %c12_107 = arith.constant 12 : index
    %c0_108 = arith.constant 0 : index
    %224 = vector.load %arg21[%c12_107, %c0_108] : memref<36x100xf32, #tpu.memory_space<vmem>>, vector<4x100xf32>
    tpu.vector_store %arg21[%c12_107, %c0_108], %223 {strides = array<i32>} : memref<36x100xf32, #tpu.memory_space<vmem>>, vector<4x100xf32>,
    %c0_109 = arith.constant 0 : index
    %c11_110 = arith.constant 11 : index
    %225 = vector.load %arg18[%c0_109, %c11_110] : memref<4x122xf32, #tpu.memory_space<vmem>>, vector<4x100xf32>
    %c16_111 = arith.constant 16 : index
    %c0_112 = arith.constant 0 : index
    %226 = vector.load %arg21[%c16_111, %c0_112] : memref<36x100xf32, #tpu.memory_space<vmem>>, vector<4x100xf32>
    tpu.vector_store %arg21[%c16_111, %c0_112], %225 {strides = array<i32>} : memref<36x100xf32, #tpu.memory_space<vmem>>, vector<4x100xf32>,
    %c0_113 = arith.constant 0 : index
    %c11_114 = arith.constant 11 : index
    %227 = vector.load %arg18[%c0_113, %c11_114] : memref<4x122xf32, #tpu.memory_space<vmem>>, vector<4x100xf32>
    %c20_115 = arith.constant 20 : index
    %c0_116 = arith.constant 0 : index
    %228 = vector.load %arg21[%c20_115, %c0_116] : memref<36x100xf32, #tpu.memory_space<vmem>>, vector<4x100xf32>
    tpu.vector_store %arg21[%c20_115, %c0_116], %227 {strides = array<i32>} : memref<36x100xf32, #tpu.memory_space<vmem>>, vector<4x100xf32>,
    %c0_117 = arith.constant 0 : index
    %c12_118 = arith.constant 12 : index
    %229 = vector.load %arg18[%c0_117, %c12_118] : memref<4x122xf32, #tpu.memory_space<vmem>>, vector<4x100xf32>
    %c24_119 = arith.constant 24 : index
    %c0_120 = arith.constant 0 : index
    %230 = vector.load %arg21[%c24_119, %c0_120] : memref<36x100xf32, #tpu.memory_space<vmem>>, vector<4x100xf32>
    tpu.vector_store %arg21[%c24_119, %c0_120], %229 {strides = array<i32>} : memref<36x100xf32, #tpu.memory_space<vmem>>, vector<4x100xf32>,
    %c0_121 = arith.constant 0 : index
    %c11_122 = arith.constant 11 : index
    %231 = vector.load %arg18[%c0_121, %c11_122] : memref<4x122xf32, #tpu.memory_space<vmem>>, vector<4x100xf32>
    %c28_123 = arith.constant 28 : index
    %c0_124 = arith.constant 0 : index
    %232 = vector.load %arg21[%c28_123, %c0_124] : memref<36x100xf32, #tpu.memory_space<vmem>>, vector<4x100xf32>
    tpu.vector_store %arg21[%c28_123, %c0_124], %231 {strides = array<i32>} : memref<36x100xf32, #tpu.memory_space<vmem>>, vector<4x100xf32>,
    %c0_125 = arith.constant 0 : index
    %c11_126 = arith.constant 11 : index
    %233 = vector.load %arg18[%c0_125, %c11_126] : memref<4x122xf32, #tpu.memory_space<vmem>>, vector<4x100xf32>
    %c32_127 = arith.constant 32 : index
    %c0_128 = arith.constant 0 : index
    %234 = vector.load %arg21[%c32_127, %c0_128] : memref<36x100xf32, #tpu.memory_space<vmem>>, vector<4x100xf32>
    tpu.vector_store %arg21[%c32_127, %c0_128], %233 {strides = array<i32>} : memref<36x100xf32, #tpu.memory_space<vmem>>, vector<4x100xf32>,
    %c0_129 = arith.constant 0 : index
    %c0_130 = arith.constant 0 : index
    %235 = vector.load %arg11[%c0_129, %c0_130] : memref<16x36xbf16, #tpu.memory_space<vmem>>, vector<16x36xbf16>
    %c0_131 = arith.constant 0 : index
    %c0_132 = arith.constant 0 : index
    %236 = vector.load %arg21[%c0_131, %c0_132] : memref<36x100xf32, #tpu.memory_space<vmem>>, vector<36x100xf32>
    %237 = arith.truncf %236 : vector<36x100xf32> to vector<36x100xbf16>
    %cst_133 = arith.constant dense<0.000000e+00> : vector<16x100xf32>
    %238 = tpu.matmul %235, %237, %cst_133 {dimension_numbers = #tpu.dot_dimension_numbers<[1], [0], [0], [1], [0, 0, 1, 1], [], []>} : vector<16x36xbf16>, vector<36x100xbf16>, vector<16x100xf32> -> vector<16x100xf32>
    %c0_134 = arith.constant 0 : index
    %c0_135 = arith.constant 0 : index
    %239 = vector.load %arg12[%c0_134, %c0_135] : memref<16x1xf32, #tpu.memory_space<vmem>>, vector<16x1xf32>
    %240 = vector.broadcast %239 : vector<16x1xf32> to vector<16x100xf32>
    %241 = arith.addf %238, %240 : vector<16x100xf32>
    %242 = vector.broadcast %6 : vector<1x100xf32> to vector<16x100xf32>
    %243 = arith.mulf %241, %242 : vector<16x100xf32>
    %244 = vector.extract_strided_slice %243 {offsets = [0, 0], sizes = [4, 100], strides = [1, 1]} : vector<16x100xf32> to vector<4x100xf32>
    %c0_136 = arith.constant 0 : index
    %c11_137 = arith.constant 11 : index
    %245 = vector.load %arg19[%c0_136, %c11_137] : memref<64x122xf32, #tpu.memory_space<vmem>>, vector<4x100xf32>
    tpu.vector_store %arg19[%c0_136, %c11_137], %244 {strides = array<i32>} : memref<64x122xf32, #tpu.memory_space<vmem>>, vector<4x100xf32>,
    %246 = vector.extract_strided_slice %243 {offsets = [4, 0], sizes = [4, 100], strides = [1, 1]} : vector<16x100xf32> to vector<4x100xf32>
    %c16_138 = arith.constant 16 : index
    %c11_139 = arith.constant 11 : index
    %247 = vector.load %arg19[%c16_138, %c11_139] : memref<64x122xf32, #tpu.memory_space<vmem>>, vector<4x100xf32>
    tpu.vector_store %arg19[%c16_138, %c11_139], %246 {strides = array<i32>} : memref<64x122xf32, #tpu.memory_space<vmem>>, vector<4x100xf32>,
    %248 = vector.extract_strided_slice %243 {offsets = [8, 0], sizes = [4, 100], strides = [1, 1]} : vector<16x100xf32> to vector<4x100xf32>
    %c32_140 = arith.constant 32 : index
    %c11_141 = arith.constant 11 : index
    %249 = vector.load %arg19[%c32_140, %c11_141] : memref<64x122xf32, #tpu.memory_space<vmem>>, vector<4x100xf32>
    tpu.vector_store %arg19[%c32_140, %c11_141], %248 {strides = array<i32>} : memref<64x122xf32, #tpu.memory_space<vmem>>, vector<4x100xf32>,
    %250 = vector.extract_strided_slice %243 {offsets = [12, 0], sizes = [4, 100], strides = [1, 1]} : vector<16x100xf32> to vector<4x100xf32>
    %c48 = arith.constant 48 : index
    %c11_142 = arith.constant 11 : index
    %251 = vector.load %arg19[%c48, %c11_142] : memref<64x122xf32, #tpu.memory_space<vmem>>, vector<4x100xf32>
    tpu.vector_store %arg19[%c48, %c11_142], %250 {strides = array<i32>} : memref<64x122xf32, #tpu.memory_space<vmem>>, vector<4x100xf32>,
    %c48_143 = arith.constant 48 : index
    %c0_144 = arith.constant 0 : index
    %252 = vector.load %arg19[%c48_143, %c0_144] : memref<64x122xf32, #tpu.memory_space<vmem>>, vector<16x100xf32>
    %c0_145 = arith.constant 0 : index
    %c0_146 = arith.constant 0 : index
    %253 = vector.load %arg22[%c0_145, %c0_146] : memref<144x400xf32, #tpu.memory_space<vmem>>, vector<16x100xf32>
    tpu.vector_store %arg22[%c0_145, %c0_146], %252 {strides = array<i32>} : memref<144x400xf32, #tpu.memory_space<vmem>>, vector<16x100xf32>,
    %c32_147 = arith.constant 32 : index
    %c1_148 = arith.constant 1 : index
    %254 = vector.load %arg19[%c32_147, %c1_148] : memref<64x122xf32, #tpu.memory_space<vmem>>, vector<16x100xf32>
    %c16_149 = arith.constant 16 : index
    %c0_150 = arith.constant 0 : index
    %255 = vector.load %arg22[%c16_149, %c0_150] : memref<144x400xf32, #tpu.memory_space<vmem>>, vector<16x100xf32>
    tpu.vector_store %arg22[%c16_149, %c0_150], %254 {strides = array<i32>} : memref<144x400xf32, #tpu.memory_space<vmem>>, vector<16x100xf32>,
    %c48_151 = arith.constant 48 : index
    %c1_152 = arith.constant 1 : index
    %256 = vector.load %arg19[%c48_151, %c1_152] : memref<64x122xf32, #tpu.memory_space<vmem>>, vector<16x100xf32>
    %c32_153 = arith.constant 32 : index
    %c0_154 = arith.constant 0 : index
    %257 = vector.load %arg22[%c32_153, %c0_154] : memref<144x400xf32, #tpu.memory_space<vmem>>, vector<16x100xf32>
    tpu.vector_store %arg22[%c32_153, %c0_154], %256 {strides = array<i32>} : memref<144x400xf32, #tpu.memory_space<vmem>>, vector<16x100xf32>,
    %c16_155 = arith.constant 16 : index
    %c10_156 = arith.constant 10 : index
    %258 = vector.load %arg19[%c16_155, %c10_156] : memref<64x122xf32, #tpu.memory_space<vmem>>, vector<16x100xf32>
    %c48_157 = arith.constant 48 : index
    %c0_158 = arith.constant 0 : index
    %259 = vector.load %arg22[%c48_157, %c0_158] : memref<144x400xf32, #tpu.memory_space<vmem>>, vector<16x100xf32>
    tpu.vector_store %arg22[%c48_157, %c0_158], %258 {strides = array<i32>} : memref<144x400xf32, #tpu.memory_space<vmem>>, vector<16x100xf32>,
    %c0_159 = arith.constant 0 : index
    %c11_160 = arith.constant 11 : index
    %260 = vector.load %arg19[%c0_159, %c11_160] : memref<64x122xf32, #tpu.memory_space<vmem>>, vector<16x100xf32>
    %c64 = arith.constant 64 : index
    %c0_161 = arith.constant 0 : index
    %261 = vector.load %arg22[%c64, %c0_161] : memref<144x400xf32, #tpu.memory_space<vmem>>, vector<16x100xf32>
    tpu.vector_store %arg22[%c64, %c0_161], %260 {strides = array<i32>} : memref<144x400xf32, #tpu.memory_space<vmem>>, vector<16x100xf32>,
    %c16_162 = arith.constant 16 : index
    %c11_163 = arith.constant 11 : index
    %262 = vector.load %arg19[%c16_162, %c11_163] : memref<64x122xf32, #tpu.memory_space<vmem>>, vector<16x100xf32>
    %c80 = arith.constant 80 : index
    %c0_164 = arith.constant 0 : index
    %263 = vector.load %arg22[%c80, %c0_164] : memref<144x400xf32, #tpu.memory_space<vmem>>, vector<16x100xf32>
    tpu.vector_store %arg22[%c80, %c0_164], %262 {strides = array<i32>} : memref<144x400xf32, #tpu.memory_space<vmem>>, vector<16x100xf32>,
    %c48_165 = arith.constant 48 : index
    %c10_166 = arith.constant 10 : index
    %264 = vector.load %arg19[%c48_165, %c10_166] : memref<64x122xf32, #tpu.memory_space<vmem>>, vector<16x100xf32>
    %c96 = arith.constant 96 : index
    %c0_167 = arith.constant 0 : index
    %265 = vector.load %arg22[%c96, %c0_167] : memref<144x400xf32, #tpu.memory_space<vmem>>, vector<16x100xf32>
    tpu.vector_store %arg22[%c96, %c0_167], %264 {strides = array<i32>} : memref<144x400xf32, #tpu.memory_space<vmem>>, vector<16x100xf32>,
    %c32_168 = arith.constant 32 : index
    %c11_169 = arith.constant 11 : index
    %266 = vector.load %arg19[%c32_168, %c11_169] : memref<64x122xf32, #tpu.memory_space<vmem>>, vector<16x100xf32>
    %c112 = arith.constant 112 : index
    %c0_170 = arith.constant 0 : index
    %267 = vector.load %arg22[%c112, %c0_170] : memref<144x400xf32, #tpu.memory_space<vmem>>, vector<16x100xf32>
    tpu.vector_store %arg22[%c112, %c0_170], %266 {strides = array<i32>} : memref<144x400xf32, #tpu.memory_space<vmem>>, vector<16x100xf32>,
    %c48_171 = arith.constant 48 : index
    %c11_172 = arith.constant 11 : index
    %268 = vector.load %arg19[%c48_171, %c11_172] : memref<64x122xf32, #tpu.memory_space<vmem>>, vector<16x100xf32>
    %c128 = arith.constant 128 : index
    %c0_173 = arith.constant 0 : index
    %269 = vector.load %arg22[%c128, %c0_173] : memref<144x400xf32, #tpu.memory_space<vmem>>, vector<16x100xf32>
    tpu.vector_store %arg22[%c128, %c0_173], %268 {strides = array<i32>} : memref<144x400xf32, #tpu.memory_space<vmem>>, vector<16x100xf32>,
    %c32_174 = arith.constant 32 : index
    %c1_175 = arith.constant 1 : index
    %270 = vector.load %arg19[%c32_174, %c1_175] : memref<64x122xf32, #tpu.memory_space<vmem>>, vector<16x100xf32>
    %c0_176 = arith.constant 0 : index
    %c100 = arith.constant 100 : index
    %271 = vector.load %arg22[%c0_176, %c100] : memref<144x400xf32, #tpu.memory_space<vmem>>, vector<16x100xf32>
    tpu.vector_store %arg22[%c0_176, %c100], %270 {strides = array<i32>} : memref<144x400xf32, #tpu.memory_space<vmem>>, vector<16x100xf32>,
    %c48_177 = arith.constant 48 : index
    %c1_178 = arith.constant 1 : index
    %272 = vector.load %arg19[%c48_177, %c1_178] : memref<64x122xf32, #tpu.memory_space<vmem>>, vector<16x100xf32>
    %c16_179 = arith.constant 16 : index
    %c100_180 = arith.constant 100 : index
    %273 = vector.load %arg22[%c16_179, %c100_180] : memref<144x400xf32, #tpu.memory_space<vmem>>, vector<16x100xf32>
    tpu.vector_store %arg22[%c16_179, %c100_180], %272 {strides = array<i32>} : memref<144x400xf32, #tpu.memory_space<vmem>>, vector<16x100xf32>,
    %c32_181 = arith.constant 32 : index
    %c2 = arith.constant 2 : index
    %274 = vector.load %arg19[%c32_181, %c2] : memref<64x122xf32, #tpu.memory_space<vmem>>, vector<16x100xf32>
    %c32_182 = arith.constant 32 : index
    %c100_183 = arith.constant 100 : index
    %275 = vector.load %arg22[%c32_182, %c100_183] : memref<144x400xf32, #tpu.memory_space<vmem>>, vector<16x100xf32>
    tpu.vector_store %arg22[%c32_182, %c100_183], %274 {strides = array<i32>} : memref<144x400xf32, #tpu.memory_space<vmem>>, vector<16x100xf32>,
    %c0_184 = arith.constant 0 : index
    %c11_185 = arith.constant 11 : index
    %276 = vector.load %arg19[%c0_184, %c11_185] : memref<64x122xf32, #tpu.memory_space<vmem>>, vector<16x100xf32>
    %c48_186 = arith.constant 48 : index
    %c100_187 = arith.constant 100 : index
    %277 = vector.load %arg22[%c48_186, %c100_187] : memref<144x400xf32, #tpu.memory_space<vmem>>, vector<16x100xf32>
    tpu.vector_store %arg22[%c48_186, %c100_187], %276 {strides = array<i32>} : memref<144x400xf32, #tpu.memory_space<vmem>>, vector<16x100xf32>,
    %c16_188 = arith.constant 16 : index
    %c11_189 = arith.constant 11 : index
    %278 = vector.load %arg19[%c16_188, %c11_189] : memref<64x122xf32, #tpu.memory_space<vmem>>, vector<16x100xf32>
    %c64_190 = arith.constant 64 : index
    %c100_191 = arith.constant 100 : index
    %279 = vector.load %arg22[%c64_190, %c100_191] : memref<144x400xf32, #tpu.memory_space<vmem>>, vector<16x100xf32>
    tpu.vector_store %arg22[%c64_190, %c100_191], %278 {strides = array<i32>} : memref<144x400xf32, #tpu.memory_space<vmem>>, vector<16x100xf32>,
    %c0_192 = arith.constant 0 : index
    %c12_193 = arith.constant 12 : index
    %280 = vector.load %arg19[%c0_192, %c12_193] : memref<64x122xf32, #tpu.memory_space<vmem>>, vector<16x100xf32>
    %c80_194 = arith.constant 80 : index
    %c100_195 = arith.constant 100 : index
    %281 = vector.load %arg22[%c80_194, %c100_195] : memref<144x400xf32, #tpu.memory_space<vmem>>, vector<16x100xf32>
    tpu.vector_store %arg22[%c80_194, %c100_195], %280 {strides = array<i32>} : memref<144x400xf32, #tpu.memory_space<vmem>>, vector<16x100xf32>,
    %c32_196 = arith.constant 32 : index
    %c11_197 = arith.constant 11 : index
    %282 = vector.load %arg19[%c32_196, %c11_197] : memref<64x122xf32, #tpu.memory_space<vmem>>, vector<16x100xf32>
    %c96_198 = arith.constant 96 : index
    %c100_199 = arith.constant 100 : index
    %283 = vector.load %arg22[%c96_198, %c100_199] : memref<144x400xf32, #tpu.memory_space<vmem>>, vector<16x100xf32>
    tpu.vector_store %arg22[%c96_198, %c100_199], %282 {strides = array<i32>} : memref<144x400xf32, #tpu.memory_space<vmem>>, vector<16x100xf32>,
    %c48_200 = arith.constant 48 : index
    %c11_201 = arith.constant 11 : index
    %284 = vector.load %arg19[%c48_200, %c11_201] : memref<64x122xf32, #tpu.memory_space<vmem>>, vector<16x100xf32>
    %c112_202 = arith.constant 112 : index
    %c100_203 = arith.constant 100 : index
    %285 = vector.load %arg22[%c112_202, %c100_203] : memref<144x400xf32, #tpu.memory_space<vmem>>, vector<16x100xf32>
    tpu.vector_store %arg22[%c112_202, %c100_203], %284 {strides = array<i32>} : memref<144x400xf32, #tpu.memory_space<vmem>>, vector<16x100xf32>,
    %c32_204 = arith.constant 32 : index
    %c12_205 = arith.constant 12 : index
    %286 = vector.load %arg19[%c32_204, %c12_205] : memref<64x122xf32, #tpu.memory_space<vmem>>, vector<16x100xf32>
    %c128_206 = arith.constant 128 : index
    %c100_207 = arith.constant 100 : index
    %287 = vector.load %arg22[%c128_206, %c100_207] : memref<144x400xf32, #tpu.memory_space<vmem>>, vector<16x100xf32>
    tpu.vector_store %arg22[%c128_206, %c100_207], %286 {strides = array<i32>} : memref<144x400xf32, #tpu.memory_space<vmem>>, vector<16x100xf32>,
    %c16_208 = arith.constant 16 : index
    %c10_209 = arith.constant 10 : index
    %288 = vector.load %arg19[%c16_208, %c10_209] : memref<64x122xf32, #tpu.memory_space<vmem>>, vector<16x100xf32>
    %c0_210 = arith.constant 0 : index
    %c200 = arith.constant 200 : index
    %289 = vector.load %arg22[%c0_210, %c200] : memref<144x400xf32, #tpu.memory_space<vmem>>, vector<16x100xf32>
    tpu.vector_store %arg22[%c0_210, %c200], %288 {strides = array<i32>} : memref<144x400xf32, #tpu.memory_space<vmem>>, vector<16x100xf32>,
    %c0_211 = arith.constant 0 : index
    %c11_212 = arith.constant 11 : index
    %290 = vector.load %arg19[%c0_211, %c11_212] : memref<64x122xf32, #tpu.memory_space<vmem>>, vector<16x100xf32>
    %c16_213 = arith.constant 16 : index
    %c200_214 = arith.constant 200 : index
    %291 = vector.load %arg22[%c16_213, %c200_214] : memref<144x400xf32, #tpu.memory_space<vmem>>, vector<16x100xf32>
    tpu.vector_store %arg22[%c16_213, %c200_214], %290 {strides = array<i32>} : memref<144x400xf32, #tpu.memory_space<vmem>>, vector<16x100xf32>,
    %c16_215 = arith.constant 16 : index
    %c11_216 = arith.constant 11 : index
    %292 = vector.load %arg19[%c16_215, %c11_216] : memref<64x122xf32, #tpu.memory_space<vmem>>, vector<16x100xf32>
    %c32_217 = arith.constant 32 : index
    %c200_218 = arith.constant 200 : index
    %293 = vector.load %arg22[%c32_217, %c200_218] : memref<144x400xf32, #tpu.memory_space<vmem>>, vector<16x100xf32>
    tpu.vector_store %arg22[%c32_217, %c200_218], %292 {strides = array<i32>} : memref<144x400xf32, #tpu.memory_space<vmem>>, vector<16x100xf32>,
    %c48_219 = arith.constant 48 : index
    %c10_220 = arith.constant 10 : index
    %294 = vector.load %arg19[%c48_219, %c10_220] : memref<64x122xf32, #tpu.memory_space<vmem>>, vector<16x100xf32>
    %c48_221 = arith.constant 48 : index
    %c200_222 = arith.constant 200 : index
    %295 = vector.load %arg22[%c48_221, %c200_222] : memref<144x400xf32, #tpu.memory_space<vmem>>, vector<16x100xf32>
    tpu.vector_store %arg22[%c48_221, %c200_222], %294 {strides = array<i32>} : memref<144x400xf32, #tpu.memory_space<vmem>>, vector<16x100xf32>,
    %c32_223 = arith.constant 32 : index
    %c11_224 = arith.constant 11 : index
    %296 = vector.load %arg19[%c32_223, %c11_224] : memref<64x122xf32, #tpu.memory_space<vmem>>, vector<16x100xf32>
    %c64_225 = arith.constant 64 : index
    %c200_226 = arith.constant 200 : index
    %297 = vector.load %arg22[%c64_225, %c200_226] : memref<144x400xf32, #tpu.memory_space<vmem>>, vector<16x100xf32>
    tpu.vector_store %arg22[%c64_225, %c200_226], %296 {strides = array<i32>} : memref<144x400xf32, #tpu.memory_space<vmem>>, vector<16x100xf32>,
    %c48_227 = arith.constant 48 : index
    %c11_228 = arith.constant 11 : index
    %298 = vector.load %arg19[%c48_227, %c11_228] : memref<64x122xf32, #tpu.memory_space<vmem>>, vector<16x100xf32>
    %c80_229 = arith.constant 80 : index
    %c200_230 = arith.constant 200 : index
    %299 = vector.load %arg22[%c80_229, %c200_230] : memref<144x400xf32, #tpu.memory_space<vmem>>, vector<16x100xf32>
    tpu.vector_store %arg22[%c80_229, %c200_230], %298 {strides = array<i32>} : memref<144x400xf32, #tpu.memory_space<vmem>>, vector<16x100xf32>,
    %c16_231 = arith.constant 16 : index
    %c20_232 = arith.constant 20 : index
    %300 = vector.load %arg19[%c16_231, %c20_232] : memref<64x122xf32, #tpu.memory_space<vmem>>, vector<16x100xf32>
    %c96_233 = arith.constant 96 : index
    %c200_234 = arith.constant 200 : index
    %301 = vector.load %arg22[%c96_233, %c200_234] : memref<144x400xf32, #tpu.memory_space<vmem>>, vector<16x100xf32>
    tpu.vector_store %arg22[%c96_233, %c200_234], %300 {strides = array<i32>} : memref<144x400xf32, #tpu.memory_space<vmem>>, vector<16x100xf32>,
    %c0_235 = arith.constant 0 : index
    %c21_236 = arith.constant 21 : index
    %302 = vector.load %arg19[%c0_235, %c21_236] : memref<64x122xf32, #tpu.memory_space<vmem>>, vector<16x100xf32>
    %c112_237 = arith.constant 112 : index
    %c200_238 = arith.constant 200 : index
    %303 = vector.load %arg22[%c112_237, %c200_238] : memref<144x400xf32, #tpu.memory_space<vmem>>, vector<16x100xf32>
    tpu.vector_store %arg22[%c112_237, %c200_238], %302 {strides = array<i32>} : memref<144x400xf32, #tpu.memory_space<vmem>>, vector<16x100xf32>,
    %c16_239 = arith.constant 16 : index
    %c21_240 = arith.constant 21 : index
    %304 = vector.load %arg19[%c16_239, %c21_240] : memref<64x122xf32, #tpu.memory_space<vmem>>, vector<16x100xf32>
    %c128_241 = arith.constant 128 : index
    %c200_242 = arith.constant 200 : index
    %305 = vector.load %arg22[%c128_241, %c200_242] : memref<144x400xf32, #tpu.memory_space<vmem>>, vector<16x100xf32>
    tpu.vector_store %arg22[%c128_241, %c200_242], %304 {strides = array<i32>} : memref<144x400xf32, #tpu.memory_space<vmem>>, vector<16x100xf32>,
    %c0_243 = arith.constant 0 : index
    %c11_244 = arith.constant 11 : index
    %306 = vector.load %arg19[%c0_243, %c11_244] : memref<64x122xf32, #tpu.memory_space<vmem>>, vector<16x100xf32>
    %c0_245 = arith.constant 0 : index
    %c300 = arith.constant 300 : index
    %307 = vector.load %arg22[%c0_245, %c300] : memref<144x400xf32, #tpu.memory_space<vmem>>, vector<16x100xf32>
    tpu.vector_store %arg22[%c0_245, %c300], %306 {strides = array<i32>} : memref<144x400xf32, #tpu.memory_space<vmem>>, vector<16x100xf32>,
    %c16_246 = arith.constant 16 : index
    %c11_247 = arith.constant 11 : index
    %308 = vector.load %arg19[%c16_246, %c11_247] : memref<64x122xf32, #tpu.memory_space<vmem>>, vector<16x100xf32>
    %c16_248 = arith.constant 16 : index
    %c300_249 = arith.constant 300 : index
    %309 = vector.load %arg22[%c16_248, %c300_249] : memref<144x400xf32, #tpu.memory_space<vmem>>, vector<16x100xf32>
    tpu.vector_store %arg22[%c16_248, %c300_249], %308 {strides = array<i32>} : memref<144x400xf32, #tpu.memory_space<vmem>>, vector<16x100xf32>,
    %c0_250 = arith.constant 0 : index
    %c12_251 = arith.constant 12 : index
    %310 = vector.load %arg19[%c0_250, %c12_251] : memref<64x122xf32, #tpu.memory_space<vmem>>, vector<16x100xf32>
    %c32_252 = arith.constant 32 : index
    %c300_253 = arith.constant 300 : index
    %311 = vector.load %arg22[%c32_252, %c300_253] : memref<144x400xf32, #tpu.memory_space<vmem>>, vector<16x100xf32>
    tpu.vector_store %arg22[%c32_252, %c300_253], %310 {strides = array<i32>} : memref<144x400xf32, #tpu.memory_space<vmem>>, vector<16x100xf32>,
    %c32_254 = arith.constant 32 : index
    %c11_255 = arith.constant 11 : index
    %312 = vector.load %arg19[%c32_254, %c11_255] : memref<64x122xf32, #tpu.memory_space<vmem>>, vector<16x100xf32>
    %c48_256 = arith.constant 48 : index
    %c300_257 = arith.constant 300 : index
    %313 = vector.load %arg22[%c48_256, %c300_257] : memref<144x400xf32, #tpu.memory_space<vmem>>, vector<16x100xf32>
    tpu.vector_store %arg22[%c48_256, %c300_257], %312 {strides = array<i32>} : memref<144x400xf32, #tpu.memory_space<vmem>>, vector<16x100xf32>,
    %c48_258 = arith.constant 48 : index
    %c11_259 = arith.constant 11 : index
    %314 = vector.load %arg19[%c48_258, %c11_259] : memref<64x122xf32, #tpu.memory_space<vmem>>, vector<16x100xf32>
    %c64_260 = arith.constant 64 : index
    %c300_261 = arith.constant 300 : index
    %315 = vector.load %arg22[%c64_260, %c300_261] : memref<144x400xf32, #tpu.memory_space<vmem>>, vector<16x100xf32>
    tpu.vector_store %arg22[%c64_260, %c300_261], %314 {strides = array<i32>} : memref<144x400xf32, #tpu.memory_space<vmem>>, vector<16x100xf32>,
    %c32_262 = arith.constant 32 : index
    %c12_263 = arith.constant 12 : index
    %316 = vector.load %arg19[%c32_262, %c12_263] : memref<64x122xf32, #tpu.memory_space<vmem>>, vector<16x100xf32>
    %c80_264 = arith.constant 80 : index
    %c300_265 = arith.constant 300 : index
    %317 = vector.load %arg22[%c80_264, %c300_265] : memref<144x400xf32, #tpu.memory_space<vmem>>, vector<16x100xf32>
    tpu.vector_store %arg22[%c80_264, %c300_265], %316 {strides = array<i32>} : memref<144x400xf32, #tpu.memory_space<vmem>>, vector<16x100xf32>,
    %c0_266 = arith.constant 0 : index
    %c21_267 = arith.constant 21 : index
    %318 = vector.load %arg19[%c0_266, %c21_267] : memref<64x122xf32, #tpu.memory_space<vmem>>, vector<16x100xf32>
    %c96_268 = arith.constant 96 : index
    %c300_269 = arith.constant 300 : index
    %319 = vector.load %arg22[%c96_268, %c300_269] : memref<144x400xf32, #tpu.memory_space<vmem>>, vector<16x100xf32>
    tpu.vector_store %arg22[%c96_268, %c300_269], %318 {strides = array<i32>} : memref<144x400xf32, #tpu.memory_space<vmem>>, vector<16x100xf32>,
    %c16_270 = arith.constant 16 : index
    %c21_271 = arith.constant 21 : index
    %320 = vector.load %arg19[%c16_270, %c21_271] : memref<64x122xf32, #tpu.memory_space<vmem>>, vector<16x100xf32>
    %c112_272 = arith.constant 112 : index
    %c300_273 = arith.constant 300 : index
    %321 = vector.load %arg22[%c112_272, %c300_273] : memref<144x400xf32, #tpu.memory_space<vmem>>, vector<16x100xf32>
    tpu.vector_store %arg22[%c112_272, %c300_273], %320 {strides = array<i32>} : memref<144x400xf32, #tpu.memory_space<vmem>>, vector<16x100xf32>,
    %c0_274 = arith.constant 0 : index
    %c22_275 = arith.constant 22 : index
    %322 = vector.load %arg19[%c0_274, %c22_275] : memref<64x122xf32, #tpu.memory_space<vmem>>, vector<16x100xf32>
    %c128_276 = arith.constant 128 : index
    %c300_277 = arith.constant 300 : index
    %323 = vector.load %arg22[%c128_276, %c300_277] : memref<144x400xf32, #tpu.memory_space<vmem>>, vector<16x100xf32>
    tpu.vector_store %arg22[%c128_276, %c300_277], %322 {strides = array<i32>} : memref<144x400xf32, #tpu.memory_space<vmem>>, vector<16x100xf32>,
    %c0_278 = arith.constant 0 : index
    %c0_279 = arith.constant 0 : index
    %324 = vector.load %arg13[%c0_278, %c0_279] : memref<4x144xbf16, #tpu.memory_space<vmem>>, vector<4x144xbf16>
    %c0_280 = arith.constant 0 : index
    %c0_281 = arith.constant 0 : index
    %325 = vector.load %arg22[%c0_280, %c0_281] : memref<144x400xf32, #tpu.memory_space<vmem>>, vector<144x400xf32>
    %326 = arith.truncf %325 : vector<144x400xf32> to vector<144x400xbf16>
    %cst_282 = arith.constant dense<0.000000e+00> : vector<4x400xf32>
    %327 = tpu.matmul %324, %326, %cst_282 {dimension_numbers = #tpu.dot_dimension_numbers<[1], [0], [0], [1], [0, 0, 1, 1], [], []>} : vector<4x144xbf16>, vector<144x400xbf16>, vector<4x400xf32> -> vector<4x400xf32>
    %c0_283 = arith.constant 0 : index
    %c0_284 = arith.constant 0 : index
    %328 = vector.load %arg14[%c0_283, %c0_284] : memref<4x1xf32, #tpu.memory_space<vmem>>, vector<4x1xf32>
    %329 = vector.extract_strided_slice %327 {offsets = [0, 0], sizes = [4, 100], strides = [1, 1]} : vector<4x400xf32> to vector<4x100xf32>
    %330 = vector.broadcast %328 : vector<4x1xf32> to vector<4x100xf32>
    %331 = arith.addf %329, %330 : vector<4x100xf32>
    %cst_285 = arith.constant 0.000000e+00 : f32
    %332 = vector.broadcast %cst_285 : f32 to vector<4x100xf32>
    %333 = arith.cmpf oge, %331, %332 : vector<4x100xf32>
    %cst_286 = arith.constant 2.000000e-01 : f32
    %334 = vector.broadcast %cst_286 : f32 to vector<4x100xf32>
    %335 = arith.mulf %334, %331 : vector<4x100xf32>
    %336 = arith.select %333, %331, %335 : vector<4x100xi1>, vector<4x100xf32>
    %337 = vector.extract_strided_slice %8 {offsets = [0, 0], sizes = [4, 100], strides = [1, 1]} : vector<16x100xf32> to vector<4x100xf32>
    %338 = arith.subf %337, %336 : vector<4x100xf32>
    %c0_287 = arith.constant 0 : index
    %c0_288 = arith.constant 0 : index
    %c0_289 = arith.constant 0 : index
    %339 = vector.load %arg16[%c0_287, %c0_288, %c0_289] : memref<1x16x100xf32, #tpu.memory_space<vmem>>, vector<1x4x100xf32>
    %340 = vector.shape_cast %339 : vector<1x4x100xf32> to vector<4x100xf32>
    %341 = vector.shape_cast %338 : vector<4x100xf32> to vector<1x4x100xf32>
    tpu.vector_store %arg16[%c0_287, %c0_288, %c0_289], %341 {strides = array<i32>} : memref<1x16x100xf32, #tpu.memory_space<vmem>>, vector<1x4x100xf32>,
    %342 = vector.extract_strided_slice %327 {offsets = [0, 100], sizes = [4, 100], strides = [1, 1]} : vector<4x400xf32> to vector<4x100xf32>
    %343 = vector.broadcast %328 : vector<4x1xf32> to vector<4x100xf32>
    %344 = arith.addf %342, %343 : vector<4x100xf32>
    %cst_290 = arith.constant 0.000000e+00 : f32
    %345 = vector.broadcast %cst_290 : f32 to vector<4x100xf32>
    %346 = arith.cmpf oge, %344, %345 : vector<4x100xf32>
    %cst_291 = arith.constant 2.000000e-01 : f32
    %347 = vector.broadcast %cst_291 : f32 to vector<4x100xf32>
    %348 = arith.mulf %347, %344 : vector<4x100xf32>
    %349 = arith.select %346, %344, %348 : vector<4x100xi1>, vector<4x100xf32>
    %350 = vector.extract_strided_slice %8 {offsets = [4, 0], sizes = [4, 100], strides = [1, 1]} : vector<16x100xf32> to vector<4x100xf32>
    %351 = arith.subf %350, %349 : vector<4x100xf32>
    %c0_292 = arith.constant 0 : index
    %c4_293 = arith.constant 4 : index
    %c0_294 = arith.constant 0 : index
    %352 = vector.load %arg16[%c0_292, %c4_293, %c0_294] : memref<1x16x100xf32, #tpu.memory_space<vmem>>, vector<1x4x100xf32>
    %353 = vector.shape_cast %352 : vector<1x4x100xf32> to vector<4x100xf32>
    %354 = vector.shape_cast %351 : vector<4x100xf32> to vector<1x4x100xf32>
    tpu.vector_store %arg16[%c0_292, %c4_293, %c0_294], %354 {strides = array<i32>} : memref<1x16x100xf32, #tpu.memory_space<vmem>>, vector<1x4x100xf32>,
    %355 = vector.extract_strided_slice %327 {offsets = [0, 200], sizes = [4, 100], strides = [1, 1]} : vector<4x400xf32> to vector<4x100xf32>
    %356 = vector.broadcast %328 : vector<4x1xf32> to vector<4x100xf32>
    %357 = arith.addf %355, %356 : vector<4x100xf32>
    %cst_295 = arith.constant 0.000000e+00 : f32
    %358 = vector.broadcast %cst_295 : f32 to vector<4x100xf32>
    %359 = arith.cmpf oge, %357, %358 : vector<4x100xf32>
    %cst_296 = arith.constant 2.000000e-01 : f32
    %360 = vector.broadcast %cst_296 : f32 to vector<4x100xf32>
    %361 = arith.mulf %360, %357 : vector<4x100xf32>
    %362 = arith.select %359, %357, %361 : vector<4x100xi1>, vector<4x100xf32>
    %363 = vector.extract_strided_slice %8 {offsets = [8, 0], sizes = [4, 100], strides = [1, 1]} : vector<16x100xf32> to vector<4x100xf32>
    %364 = arith.subf %363, %362 : vector<4x100xf32>
    %c0_297 = arith.constant 0 : index
    %c8_298 = arith.constant 8 : index
    %c0_299 = arith.constant 0 : index
    %365 = vector.load %arg16[%c0_297, %c8_298, %c0_299] : memref<1x16x100xf32, #tpu.memory_space<vmem>>, vector<1x4x100xf32>
    %366 = vector.shape_cast %365 : vector<1x4x100xf32> to vector<4x100xf32>
    %367 = vector.shape_cast %364 : vector<4x100xf32> to vector<1x4x100xf32>
    tpu.vector_store %arg16[%c0_297, %c8_298, %c0_299], %367 {strides = array<i32>} : memref<1x16x100xf32, #tpu.memory_space<vmem>>, vector<1x4x100xf32>,
    %368 = vector.extract_strided_slice %327 {offsets = [0, 300], sizes = [4, 100], strides = [1, 1]} : vector<4x400xf32> to vector<4x100xf32>
    %369 = vector.broadcast %328 : vector<4x1xf32> to vector<4x100xf32>
    %370 = arith.addf %368, %369 : vector<4x100xf32>
    %cst_300 = arith.constant 0.000000e+00 : f32
    %371 = vector.broadcast %cst_300 : f32 to vector<4x100xf32>
    %372 = arith.cmpf oge, %370, %371 : vector<4x100xf32>
    %cst_301 = arith.constant 2.000000e-01 : f32
    %373 = vector.broadcast %cst_301 : f32 to vector<4x100xf32>
    %374 = arith.mulf %373, %370 : vector<4x100xf32>
    %375 = arith.select %372, %370, %374 : vector<4x100xi1>, vector<4x100xf32>
    %376 = vector.extract_strided_slice %8 {offsets = [12, 0], sizes = [4, 100], strides = [1, 1]} : vector<16x100xf32> to vector<4x100xf32>
    %377 = arith.subf %376, %375 : vector<4x100xf32>
    %c0_302 = arith.constant 0 : index
    %c12_303 = arith.constant 12 : index
    %c0_304 = arith.constant 0 : index
    %378 = vector.load %arg16[%c0_302, %c12_303, %c0_304] : memref<1x16x100xf32, #tpu.memory_space<vmem>>, vector<1x4x100xf32>
    %379 = vector.shape_cast %378 : vector<1x4x100xf32> to vector<4x100xf32>
    %380 = vector.shape_cast %377 : vector<4x100xf32> to vector<1x4x100xf32>
    tpu.vector_store %arg16[%c0_302, %c12_303, %c0_304], %380 {strides = array<i32>} : memref<1x16x100xf32, #tpu.memory_space<vmem>>, vector<1x4x100xf32>,
    return
  }
  func.func @transform_0(%arg0: i32) -> (i32, i32, i32) {
    %c0_i32 = arith.constant 0 : i32
    %c0_i32_0 = arith.constant 0 : i32
    %c0_i32_1 = arith.constant 0 : i32
    return %arg0, %c0_i32, %c0_i32_0 : i32, i32, i32
  }
  func.func @transform_1(%arg0: i32) -> (i32, i32, i32) {
    %c0_i32 = arith.constant 0 : i32
    %c0_i32_0 = arith.constant 0 : i32
    %c0_i32_1 = arith.constant 0 : i32
    return %arg0, %c0_i32, %c0_i32_0 : i32, i32, i32
  }
  func.func @transform_2(%arg0: i32) -> (i32, i32, i32) {
    %c0_i32 = arith.constant 0 : i32
    %c0_i32_0 = arith.constant 0 : i32
    %c0_i32_1 = arith.constant 0 : i32
    return %arg0, %c0_i32, %c0_i32_0 : i32, i32, i32
  }
  func.func @transform_3(%arg0: i32) -> (i32, i32, i32) {
    %c0_i32 = arith.constant 0 : i32
    %c0_i32_0 = arith.constant 0 : i32
    %c0_i32_1 = arith.constant 0 : i32
    return %arg0, %c0_i32, %c0_i32_0 : i32, i32, i32
  }
  func.func @transform_4(%arg0: i32) -> (i32, i32, i32) {
    %c0_i32 = arith.constant 0 : i32
    %c0_i32_0 = arith.constant 0 : i32
    %c0_i32_1 = arith.constant 0 : i32
    return %arg0, %c0_i32, %c0_i32_0 : i32, i32, i32
  }
  func.func @transform_5(%arg0: i32) -> (i32, i32, i32) {
    %c0_i32 = arith.constant 0 : i32
    %c0_i32_0 = arith.constant 0 : i32
    %c0_i32_1 = arith.constant 0 : i32
    return %arg0, %c0_i32, %c0_i32_0 : i32, i32, i32
  }
  func.func @transform_6(%arg0: i32) -> (i32, i32, i32) {
    %c0_i32 = arith.constant 0 : i32
    %c0_i32_0 = arith.constant 0 : i32
    %c0_i32_1 = arith.constant 0 : i32
    return %arg0, %c0_i32, %c0_i32_0 : i32, i32, i32
  }
  func.func @transform_7(%arg0: i32) -> (i32, i32, i32) {
    %c0_i32 = arith.constant 0 : i32
    %c0_i32_0 = arith.constant 0 : i32
    %c0_i32_1 = arith.constant 0 : i32
    return %arg0, %c0_i32, %c0_i32_0 : i32, i32, i32
  }
  func.func @transform_8(%arg0: i32) -> (i32, i32) {
    %c0_i32 = arith.constant 0 : i32
    %c0_i32_0 = arith.constant 0 : i32
    %c0_i32_1 = arith.constant 0 : i32
    return %c0_i32, %c0_i32_0 : i32, i32
  }
  func.func @transform_9(%arg0: i32) -> (i32, i32) {
    %c0_i32 = arith.constant 0 : i32
    %c0_i32_0 = arith.constant 0 : i32
    %c0_i32_1 = arith.constant 0 : i32
    return %c0_i32, %c0_i32_0 : i32, i32
  }
  func.func @transform_10(%arg0: i32) -> (i32, i32) {
    %c0_i32 = arith.constant 0 : i32
    %c0_i32_0 = arith.constant 0 : i32
    %c0_i32_1 = arith.constant 0 : i32
    return %c0_i32, %c0_i32_0 : i32, i32
  }
  func.func @transform_11(%arg0: i32) -> (i32, i32) {
    %c0_i32 = arith.constant 0 : i32
    %c0_i32_0 = arith.constant 0 : i32
    %c0_i32_1 = arith.constant 0 : i32
    return %c0_i32, %c0_i32_0 : i32, i32
  }
  func.func @transform_12(%arg0: i32) -> (i32, i32) {
    %c0_i32 = arith.constant 0 : i32
    %c0_i32_0 = arith.constant 0 : i32
    %c0_i32_1 = arith.constant 0 : i32
    return %c0_i32, %c0_i32_0 : i32, i32
  }
  func.func @transform_13(%arg0: i32) -> (i32, i32) {
    %c0_i32 = arith.constant 0 : i32
    %c0_i32_0 = arith.constant 0 : i32
    %c0_i32_1 = arith.constant 0 : i32
    return %c0_i32, %c0_i32_0 : i32, i32
  }
  func.func @transform_14(%arg0: i32) -> (i32, i32) {
    %c0_i32 = arith.constant 0 : i32
    %c0_i32_0 = arith.constant 0 : i32
    %c0_i32_1 = arith.constant 0 : i32
    return %c0_i32, %c0_i32_0 : i32, i32
  }
  func.func @transform_15(%arg0: i32) -> (i32, i32, i32) {
    %c0_i32 = arith.constant 0 : i32
    %c0_i32_0 = arith.constant 0 : i32
    %c0_i32_1 = arith.constant 0 : i32
    return %arg0, %c0_i32, %c0_i32_0 : i32, i32, i32
  }
}

</mosaic_0001>

<bundles_post_ra>
// kernel: tile.8
= control target key start
LH: loop header
LB: loop body
LE: loop exit
PB: predicated region body
PF: predicated region fallthrough
CT: control target
= control target key end

     0   :  { %s22_s0 = inlined_call_operand.vmem [shape: f32[4], index: 0, kind: input, shape index: {}]   ;;  %s23_s1 = inlined_call_operand.vmem [shape: f32[4,4], index: 1, kind: output, shape index: {}]  }
   0x1   :  { %v4_v0 = vld [vmem:[%s22_s0] ss:$0 sm:$0xff] }
   0x2   :  { %5 = vst [vmem:[%s23_s1] sm:$0xf] %v4_v0 }

// kernel: tile.0
= control target key start
LH: loop header
LB: loop body
LE: loop exit
PB: predicated region body
PF: predicated region fallthrough
CT: control target
= control target key end

     0   :  { %s34_s8 = smov 125   ;;  %vm7_vm0 = vcmask 7168   ;;  %s35_s11 = smov 126   ;;  %s61_s0 = inlined_call_operand.vmem [shape: f32[4,4], index: 0, kind: input, shape index: {}]   ;;  %s62_s1 = inlined_call_operand.vmem [shape: f32[16,1], index: 1, kind: output, shape index: {}]  }
   0x1   :  { %v4_v0 = vld [vmem:[%s61_s0] sm:$0xf]  ;;  %s33_s0 = smov 127  }
   0x2   :  { %5 = vst [vmem:[#allocation0] sm:$0xf] %v4_v0 }
   0x9   :  { %v9_v1 = vld [vmem:[#allocation0] sm:$0xf]  }
   0xa   :  { %v21_v2 = vld [vmem:[#allocation0] sm:$0xf]   ;;  %10 = vrot.lane.b32.xlu0 %v9_v1, %s33_s0 }
   0xb   :  { %22 = vrot.lane.b32.xlu1 %v21_v2, %s34_s8  ;;  %v6_v3 = vld [vmem:[#allocation0] sm:$0xf]  }
   0xc   :  { %v15_v4 = vld [vmem:[#allocation0] sm:$0xf]   ;;  %8 = vst.msk [vmem:[%s62_s1] ss:$4 sm:$0xf] %vm7_vm0, %v6_v3  }
   0xe   :  { %16 = vrot.lane.b32.xlu0 %v15_v4, %s35_s11 }
  0x7c   :  { %v11_v5 = vpop.permute.xlu0 %10  }
  0x7d   :  { %v23_v6 = vpop.permute.xlu1 %22   ;;  %27 = vst.msk [vmem:[%s62_s1 + $0x1] ss:$4 sm:$0xf] %vm7_vm0, %v11_v5  }
  0x7e   :  { %29 = vst.msk [vmem:[%s62_s1 + $0x3] ss:$4 sm:$0xf] %vm7_vm0, %v23_v6  }
  0x80   :  { %v17_v7 = vpop.permute.xlu0 %16  }
  0x81   :  { %28 = vst.msk [vmem:[%s62_s1 + $0x2] ss:$4 sm:$0xf] %vm7_vm0, %v17_v7  }

</bundles_post_ra>
